<compile_context>
chip_gen: v5e
topology: v5e:2x2
jax: 0.10.0
libtpu: 0.0.40
codegen_flags: <defaults>
</compile_context>

<pallas_src>
import math

import jax
import jax.numpy as jnp
from jax.experimental import pallas as pl
from jax.experimental.pallas import tpu as pltpu

LANE = 128
ROW_ALIGN = 256  # MXU tile height on v6e/v7x; also a multiple of v5e's 128.


def _round_up(x, m):
    return (x + m - 1) // m * m


def prior_disc_kernel(x_ref, w0_ref, b0_ref, w1_ref, b1_ref, w2_ref, b2_ref,
                      o_ref):
    # One (tn, d_pad) bf16 tile of x; weights bf16, biases f32, VMEM-resident.
    x = x_ref[...]

    h = jnp.dot(x, w0_ref[...], preferred_element_type=jnp.float32) + b0_ref[...]
    h = jnp.maximum(h, 0.0)

    h = jnp.dot(h.astype(jnp.bfloat16), w1_ref[...],
                preferred_element_type=jnp.float32) + b1_ref[...]
    h = jnp.maximum(h, 0.0)

    z = jnp.dot(h.astype(jnp.bfloat16), w2_ref[...],
                preferred_element_type=jnp.float32) + b2_ref[...]
    # Only lane 0 of z is the real logit (w2/b2 zero-padded to 128 lanes).
    z0 = z[:, 0:1]
    # sigmoid = 1 / (1 + exp(-z)): exp and the approx reciprocal both go to
    # the EUP slot, keeping the VALU free.
    o_ref[...] = pl.reciprocal(1.0 + jnp.exp(-z0), approx=True).astype(o_ref.dtype)


def _vmem_capacity_bytes():
    try:
        return int(pltpu.get_tpu_info().vmem_capacity_bytes)
    except Exception:
        return 64 * 1024 * 1024  # v7x per-core size; conservative elsewhere.


def _choose_tn(n, d_pad):
    """Batch-tile height: big for small D, bounded by an activation budget."""
    if d_pad <= 256:
        cap = 4096
    elif d_pad <= 512:
        cap = 2048
    elif d_pad <= 1024:
        cap = 1024
    else:
        cap = 512
    # ~12 MiB activation budget: double-buffered bf16 x tile + ~3 live f32
    # (tn, d_pad) temporaries + double-buffered (tn, 1) out tile.
    per_row = 2 * 2 * d_pad + 3 * 4 * d_pad + 2 * 4
    budget_rows = (12 * 1024 * 1024) // per_row
    cap = max(ROW_ALIGN, min(cap, (budget_rows // ROW_ALIGN) * ROW_ALIGN))
    # Don't exceed the (row-aligned) problem size -> minimal last-tile padding.
    return min(cap, _round_up(n, ROW_ALIGN))


def prior_discriminator_forward(x, params):
    """x: [N, D] float32; params: weights [in, out] and biases [1, out]."""
    n, d = x.shape
    assert params["w0"].shape == (d, d) and params["w1"].shape == (d, d)
    assert params["w2"].shape[0] == d, (
        "weights must be [in, out]; transpose torch nn.Linear weights first")
    out_dim = params["w2"].shape[1]  # = 1

    d_pad = _round_up(d, LANE)
    h_pad = _round_up(out_dim, LANE)  # final-layer lanes; only column 0 is real

    tn = _choose_tn(n, d_pad)
    n_pad = _round_up(n, tn)

    # Zero-pad rows/features in the wrapper; padded lanes carry exact zeros
    # through L0/L1.  MXU inputs are bf16 (f32 accumulation); biases stay f32.
    x_p = jnp.pad(x, ((0, n_pad - n), (0, d_pad - d))).astype(jnp.bfloat16)
    w0_p = jnp.pad(params["w0"], ((0, d_pad - d), (0, d_pad - d))).astype(jnp.bfloat16)
    w1_p = jnp.pad(params["w1"], ((0, d_pad - d), (0, d_pad - d))).astype(jnp.bfloat16)
    w2_p = jnp.pad(params["w2"], ((0, d_pad - d), (0, h_pad - out_dim))).astype(jnp.bfloat16)
    b0_p = jnp.pad(params["b0"], ((0, 0), (0, d_pad - d))).astype(jnp.float32)
    b1_p = jnp.pad(params["b1"], ((0, 0), (0, d_pad - d))).astype(jnp.float32)
    b2_p = jnp.pad(params["b2"], ((0, 0), (0, h_pad - out_dim))).astype(jnp.float32)

    # Explicit VMEM budget (worst case: fallback path double-buffers weights).
    weight_bytes = 2 * ((2 * d_pad * d_pad + d_pad * h_pad) * 2
                        + (2 * d_pad + h_pad) * 4)
    act_bytes = tn * (2 * 2 * d_pad + 3 * 4 * d_pad + 2 * 4)
    est = weight_bytes + act_bytes + (2 << 20)
    vmem_limit = int(min(max(est, 16 << 20), int(0.85 * _vmem_capacity_bytes())))

    grid = (n_pad // tn,)
    x_spec = pl.BlockSpec((tn, d_pad), lambda i: (i, 0))
    out_spec = pl.BlockSpec((tn, 1), lambda i: (i, 0))

    def build(single_buffer_weights):
        if single_buffer_weights:
            def resident(shape):
                # Constant index_map: loaded once, stays in VMEM for all grid
                # steps; single buffer (no steady-state DMA to hide).
                return pl.BlockSpec(shape, lambda i: (0, 0),
                                    pipeline_mode=pl.Buffered(1))
        else:
            def resident(shape):
                return pl.BlockSpec(shape, lambda i: (0, 0))

        return pl.pallas_call(
            prior_disc_kernel,
            out_shape=jax.ShapeDtypeStruct((n_pad, 1), jnp.float32),
            grid=grid,
            in_specs=[
                x_spec,
                resident((d_pad, d_pad)), resident((1, d_pad)),
                resident((d_pad, d_pad)), resident((1, d_pad)),
                resident((d_pad, h_pad)), resident((1, h_pad)),
            ],
            out_specs=out_spec,
            compiler_params=pltpu.CompilerParams(
                # TODO(synk): on v7x verify the batch axis spans both
                # TensorCores; switch to pltpu.CORE_PARALLEL / pl.core_map if
                # plain "parallel" leaves the second core idle.
                dimension_semantics=("parallel",),
                vmem_limit_bytes=vmem_limit),
        )

    args = (x_p, w0_p, b0_p, w1_p, b1_p, w2_p, b2_p)
    try:
        out_p = build(True)(*args)
    except Exception:
        # pipeline_mode=pl.Buffered(1) not accepted by this jax build; the
        # unbuffered-spec path is identical math with default double-buffering.
        out_p = build(False)(*args)

    return out_p[:n, :]


def init_params(key, input_dim):
    """Deterministic PyTorch-style Linear init: U(-1/sqrt(fan_in), 1/sqrt(fan_in))."""
    keys = jax.random.split(key, 6)

    def linear(kw, kb, fan_in, fan_out):
        bound = 1.0 / math.sqrt(fan_in)
        w = jax.random.uniform(kw, (fan_in, fan_out), jnp.float32, -bound, bound)
        b = jax.random.uniform(kb, (1, fan_out), jnp.float32, -bound, bound)
        return w, b

    w0, b0 = linear(keys[0], keys[1], input_dim, input_dim)
    w1, b1 = linear(keys[2], keys[3], input_dim, input_dim)
    w2, b2 = linear(keys[4], keys[5], input_dim, 1)
    return {"w0": w0, "b0": b0, "w1": w1, "b1": b1, "w2": w2, "b2": b2}


def prior_discriminator_reference(x, p):
    h = jnp.maximum(x @ p["w0"] + p["b0"], 0.0)
    h = jnp.maximum(h @ p["w1"] + p["b1"], 0.0)
    z = h @ p["w2"] + p["b2"]
    return 1.0 / (1.0 + jnp.exp(-z))


if __name__ == "__main__":
    key = jax.random.PRNGKey(0)
    k_x, k_p = jax.random.split(key)

    N, INPUT_DIM = 8, 32
    x = jax.random.normal(k_x, (N, INPUT_DIM), jnp.float32)
    params = init_params(k_p, INPUT_DIM)

    out = prior_discriminator_forward(x, params)
    out = jax.block_until_ready(out)

    ref = prior_discriminator_reference(x, params)
    assert out.shape == (N, 1)
    # bf16 MXU inputs -> relaxed tolerance vs. the f32 reference.
    assert jnp.allclose(out, ref, atol=2e-2, rtol=2e-2), float(
        jnp.max(jnp.abs(out - ref)))

    print("KERNEL_OK")
</pallas_src>

<mosaic_0001>
module attributes {stable_mosaic.version = 11 : i64} {
  func.func @prior_disc_kernel(%arg0: i32, %arg1: memref<256x128xbf16, #tpu.memory_space<vmem>>, %arg2: memref<128x128xbf16, #tpu.memory_space<vmem>>, %arg3: memref<1x128xf32, #tpu.memory_space<vmem>>, %arg4: memref<128x128xbf16, #tpu.memory_space<vmem>>, %arg5: memref<1x128xf32, #tpu.memory_space<vmem>>, %arg6: memref<128x128xbf16, #tpu.memory_space<vmem>>, %arg7: memref<1x128xf32, #tpu.memory_space<vmem>>, %arg8: memref<256x1xf32, #tpu.memory_space<vmem>>) attributes {dimension_semantics = [#tpu.dimension_semantics<parallel>], iteration_bounds = array<i64: 1>, scalar_prefetch = 0 : i64, scratch_operands = 0 : i64, tpu.core_type = #tpu.core_type<tc>, window_params = [{transform_indices = @transform_0, window_bounds = array<i64: 256, 128>}, {pipeline_mode = #tpu.pipeline_mode<synchronous>, transform_indices = @transform_1, window_bounds = array<i64: 128, 128>}, {pipeline_mode = #tpu.pipeline_mode<synchronous>, transform_indices = @transform_2, window_bounds = array<i64: 1, 128>}, {pipeline_mode = #tpu.pipeline_mode<synchronous>, transform_indices = @transform_3, window_bounds = array<i64: 128, 128>}, {pipeline_mode = #tpu.pipeline_mode<synchronous>, transform_indices = @transform_4, window_bounds = array<i64: 1, 128>}, {pipeline_mode = #tpu.pipeline_mode<synchronous>, transform_indices = @transform_5, window_bounds = array<i64: 128, 128>}, {pipeline_mode = #tpu.pipeline_mode<synchronous>, transform_indices = @transform_6, window_bounds = array<i64: 1, 128>}, {transform_indices = @transform_7, window_bounds = array<i64: 256, 1>}]} {
    %c0 = arith.constant 0 : index
    %c0_0 = arith.constant 0 : index
    %0 = vector.load %arg1[%c0, %c0_0] : memref<256x128xbf16, #tpu.memory_space<vmem>>, vector<256x128xbf16>
    %c0_1 = arith.constant 0 : index
    %c0_2 = arith.constant 0 : index
    %1 = vector.load %arg2[%c0_1, %c0_2] : memref<128x128xbf16, #tpu.memory_space<vmem>>, vector<128x128xbf16>
    %cst = arith.constant dense<0.000000e+00> : vector<256x128xf32>
    %2 = tpu.matmul %0, %1, %cst {dimension_numbers = #tpu.dot_dimension_numbers<[1], [0], [0], [1], [0, 0, 1, 1], [], []>} : vector<256x128xbf16>, vector<128x128xbf16>, vector<256x128xf32> -> vector<256x128xf32>
    %c0_3 = arith.constant 0 : index
    %c0_4 = arith.constant 0 : index
    %3 = vector.load %arg3[%c0_3, %c0_4] : memref<1x128xf32, #tpu.memory_space<vmem>>, vector<1x128xf32>
    %4 = vector.broadcast %3 : vector<1x128xf32> to vector<256x128xf32>
    %5 = arith.addf %2, %4 : vector<256x128xf32>
    %cst_5 = arith.constant 0.000000e+00 : f32
    %6 = vector.broadcast %cst_5 : f32 to vector<256x128xf32>
    %7 = arith.maximumf %5, %6 : vector<256x128xf32>
    %8 = arith.truncf %7 : vector<256x128xf32> to vector<256x128xbf16>
    %c0_6 = arith.constant 0 : index
    %c0_7 = arith.constant 0 : index
    %9 = vector.load %arg4[%c0_6, %c0_7] : memref<128x128xbf16, #tpu.memory_space<vmem>>, vector<128x128xbf16>
    %cst_8 = arith.constant dense<0.000000e+00> : vector<256x128xf32>
    %10 = tpu.matmul %8, %9, %cst_8 {dimension_numbers = #tpu.dot_dimension_numbers<[1], [0], [0], [1], [0, 0, 1, 1], [], []>} : vector<256x128xbf16>, vector<128x128xbf16>, vector<256x128xf32> -> vector<256x128xf32>
    %c0_9 = arith.constant 0 : index
    %c0_10 = arith.constant 0 : index
    %11 = vector.load %arg5[%c0_9, %c0_10] : memref<1x128xf32, #tpu.memory_space<vmem>>, vector<1x128xf32>
    %12 = vector.broadcast %11 : vector<1x128xf32> to vector<256x128xf32>
    %13 = arith.addf %10, %12 : vector<256x128xf32>
    %cst_11 = arith.constant 0.000000e+00 : f32
    %14 = vector.broadcast %cst_11 : f32 to vector<256x128xf32>
    %15 = arith.maximumf %13, %14 : vector<256x128xf32>
    %16 = arith.truncf %15 : vector<256x128xf32> to vector<256x128xbf16>
    %c0_12 = arith.constant 0 : index
    %c0_13 = arith.constant 0 : index
    %17 = vector.load %arg6[%c0_12, %c0_13] : memref<128x128xbf16, #tpu.memory_space<vmem>>, vector<128x128xbf16>
    %cst_14 = arith.constant dense<0.000000e+00> : vector<256x128xf32>
    %18 = tpu.matmul %16, %17, %cst_14 {dimension_numbers = #tpu.dot_dimension_numbers<[1], [0], [0], [1], [0, 0, 1, 1], [], []>} : vector<256x128xbf16>, vector<128x128xbf16>, vector<256x128xf32> -> vector<256x128xf32>
    %c0_15 = arith.constant 0 : index
    %c0_16 = arith.constant 0 : index
    %19 = vector.load %arg7[%c0_15, %c0_16] : memref<1x128xf32, #tpu.memory_space<vmem>>, vector<1x128xf32>
    %20 = vector.broadcast %19 : vector<1x128xf32> to vector<256x128xf32>
    %21 = arith.addf %18, %20 : vector<256x128xf32>
    %22 = vector.extract_strided_slice %21 {offsets = [0, 0], sizes = [256, 1], strides = [1, 1]} : vector<256x128xf32> to vector<256x1xf32>
    %cst_17 = arith.constant 0.000000e+00 : f32
    %23 = vector.broadcast %cst_17 : f32 to vector<256x1xf32>
    %24 = arith.subf %23, %22 : vector<256x1xf32>
    %25 = math.exp %24 : vector<256x1xf32>
    %cst_18 = arith.constant 1.000000e+00 : f32
    %26 = vector.broadcast %cst_18 : f32 to vector<256x1xf32>
    %27 = arith.addf %26, %25 : vector<256x1xf32>
    %28 = tpu.reciprocal %27 {approx = true} : vector<256x1xf32> -> vector<256x1xf32>
    %c0_19 = arith.constant 0 : index
    %c0_20 = arith.constant 0 : index
    %29 = vector.load %arg8[%c0_19, %c0_20] : memref<256x1xf32, #tpu.memory_space<vmem>>, vector<256x1xf32>
    tpu.vector_store %arg8[%c0_19, %c0_20], %28 {strides = array<i32>} : memref<256x1xf32, #tpu.memory_space<vmem>>, vector<256x1xf32>,
    return
  }
  func.func @transform_0(%arg0: i32) -> (i32, i32) {
    %c0_i32 = arith.constant 0 : i32
    %c0_i32_0 = arith.constant 0 : i32
    return %arg0, %c0_i32 : i32, i32
  }
  func.func @transform_1(%arg0: i32) -> (i32, i32) {
    %c0_i32 = arith.constant 0 : i32
    %c0_i32_0 = arith.constant 0 : i32
    %c0_i32_1 = arith.constant 0 : i32
    return %c0_i32, %c0_i32_0 : i32, i32
  }
  func.func @transform_2(%arg0: i32) -> (i32, i32) {
    %c0_i32 = arith.constant 0 : i32
    %c0_i32_0 = arith.constant 0 : i32
    %c0_i32_1 = arith.constant 0 : i32
    return %c0_i32, %c0_i32_0 : i32, i32
  }
  func.func @transform_3(%arg0: i32) -> (i32, i32) {
    %c0_i32 = arith.constant 0 : i32
    %c0_i32_0 = arith.constant 0 : i32
    %c0_i32_1 = arith.constant 0 : i32
    return %c0_i32, %c0_i32_0 : i32, i32
  }
  func.func @transform_4(%arg0: i32) -> (i32, i32) {
    %c0_i32 = arith.constant 0 : i32
    %c0_i32_0 = arith.constant 0 : i32
    %c0_i32_1 = arith.constant 0 : i32
    return %c0_i32, %c0_i32_0 : i32, i32
  }
  func.func @transform_5(%arg0: i32) -> (i32, i32) {
    %c0_i32 = arith.constant 0 : i32
    %c0_i32_0 = arith.constant 0 : i32
    %c0_i32_1 = arith.constant 0 : i32
    return %c0_i32, %c0_i32_0 : i32, i32
  }
  func.func @transform_6(%arg0: i32) -> (i32, i32) {
    %c0_i32 = arith.constant 0 : i32
    %c0_i32_0 = arith.constant 0 : i32
    %c0_i32_1 = arith.constant 0 : i32
    return %c0_i32, %c0_i32_0 : i32, i32
  }
  func.func @transform_7(%arg0: i32) -> (i32, i32) {
    %c0_i32 = arith.constant 0 : i32
    %c0_i32_0 = arith.constant 0 : i32
    return %arg0, %c0_i32 : i32, i32
  }
}

module attributes {stable_mosaic.version = 11 : i64} {
  func.func @prior_disc_kernel(%arg0: i32, %arg1: memref<256x128xbf16, #tpu.memory_space<vmem>>, %arg2: memref<128x128xbf16, #tpu.memory_space<vmem>>, %arg3: memref<1x128xf32, #tpu.memory_space<vmem>>, %arg4: memref<128x128xbf16, #tpu.memory_space<vmem>>, %arg5: memref<1x128xf32, #tpu.memory_space<vmem>>, %arg6: memref<128x128xbf16, #tpu.memory_space<vmem>>, %arg7: memref<1x128xf32, #tpu.memory_space<vmem>>, %arg8: memref<256x1xf32, #tpu.memory_space<vmem>>) attributes {dimension_semantics = [#tpu.dimension_semantics<parallel>], iteration_bounds = array<i64: 1>, scalar_prefetch = 0 : i64, scratch_operands = 0 : i64, tpu.core_type = #tpu.core_type<tc>, window_params = [{transform_indices = @transform_0, window_bounds = array<i64: 256, 128>}, {pipeline_mode = #tpu.pipeline_mode<synchronous>, transform_indices = @transform_1, window_bounds = array<i64: 128, 128>}, {pipeline_mode = #tpu.pipeline_mode<synchronous>, transform_indices = @transform_2, window_bounds = array<i64: 1, 128>}, {pipeline_mode = #tpu.pipeline_mode<synchronous>, transform_indices = @transform_3, window_bounds = array<i64: 128, 128>}, {pipeline_mode = #tpu.pipeline_mode<synchronous>, transform_indices = @transform_4, window_bounds = array<i64: 1, 128>}, {pipeline_mode = #tpu.pipeline_mode<synchronous>, transform_indices = @transform_5, window_bounds = array<i64: 128, 128>}, {pipeline_mode = #tpu.pipeline_mode<synchronous>, transform_indices = @transform_6, window_bounds = array<i64: 1, 128>}, {transform_indices = @transform_7, window_bounds = array<i64: 256, 1>}]} {
    %c0 = arith.constant 0 : index
    %c0_0 = arith.constant 0 : index
    %0 = vector.load %arg1[%c0, %c0_0] : memref<256x128xbf16, #tpu.memory_space<vmem>>, vector<256x128xbf16>
    %c0_1 = arith.constant 0 : index
    %c0_2 = arith.constant 0 : index
    %1 = vector.load %arg2[%c0_1, %c0_2] : memref<128x128xbf16, #tpu.memory_space<vmem>>, vector<128x128xbf16>
    %cst = arith.constant dense<0.000000e+00> : vector<256x128xf32>
    %2 = tpu.matmul %0, %1, %cst {dimension_numbers = #tpu.dot_dimension_numbers<[1], [0], [0], [1], [0, 0, 1, 1], [], []>} : vector<256x128xbf16>, vector<128x128xbf16>, vector<256x128xf32> -> vector<256x128xf32>
    %c0_3 = arith.constant 0 : index
    %c0_4 = arith.constant 0 : index
    %3 = vector.load %arg3[%c0_3, %c0_4] : memref<1x128xf32, #tpu.memory_space<vmem>>, vector<1x128xf32>
    %4 = vector.broadcast %3 : vector<1x128xf32> to vector<256x128xf32>
    %5 = arith.addf %2, %4 : vector<256x128xf32>
    %cst_5 = arith.constant 0.000000e+00 : f32
    %6 = vector.broadcast %cst_5 : f32 to vector<256x128xf32>
    %7 = arith.maximumf %5, %6 : vector<256x128xf32>
    %8 = arith.truncf %7 : vector<256x128xf32> to vector<256x128xbf16>
    %c0_6 = arith.constant 0 : index
    %c0_7 = arith.constant 0 : index
    %9 = vector.load %arg4[%c0_6, %c0_7] : memref<128x128xbf16, #tpu.memory_space<vmem>>, vector<128x128xbf16>
    %cst_8 = arith.constant dense<0.000000e+00> : vector<256x128xf32>
    %10 = tpu.matmul %8, %9, %cst_8 {dimension_numbers = #tpu.dot_dimension_numbers<[1], [0], [0], [1], [0, 0, 1, 1], [], []>} : vector<256x128xbf16>, vector<128x128xbf16>, vector<256x128xf32> -> vector<256x128xf32>
    %c0_9 = arith.constant 0 : index
    %c0_10 = arith.constant 0 : index
    %11 = vector.load %arg5[%c0_9, %c0_10] : memref<1x128xf32, #tpu.memory_space<vmem>>, vector<1x128xf32>
    %12 = vector.broadcast %11 : vector<1x128xf32> to vector<256x128xf32>
    %13 = arith.addf %10, %12 : vector<256x128xf32>
    %cst_11 = arith.constant 0.000000e+00 : f32
    %14 = vector.broadcast %cst_11 : f32 to vector<256x128xf32>
    %15 = arith.maximumf %13, %14 : vector<256x128xf32>
    %16 = arith.truncf %15 : vector<256x128xf32> to vector<256x128xbf16>
    %c0_12 = arith.constant 0 : index
    %c0_13 = arith.constant 0 : index
    %17 = vector.load %arg6[%c0_12, %c0_13] : memref<128x128xbf16, #tpu.memory_space<vmem>>, vector<128x128xbf16>
    %cst_14 = arith.constant dense<0.000000e+00> : vector<256x128xf32>
    %18 = tpu.matmul %16, %17, %cst_14 {dimension_numbers = #tpu.dot_dimension_numbers<[1], [0], [0], [1], [0, 0, 1, 1], [], []>} : vector<256x128xbf16>, vector<128x128xbf16>, vector<256x128xf32> -> vector<256x128xf32>
    %c0_15 = arith.constant 0 : index
    %c0_16 = arith.constant 0 : index
    %19 = vector.load %arg7[%c0_15, %c0_16] : memref<1x128xf32, #tpu.memory_space<vmem>>, vector<1x128xf32>
    %20 = vector.broadcast %19 : vector<1x128xf32> to vector<256x128xf32>
    %21 = arith.addf %18, %20 : vector<256x128xf32>
    %22 = vector.extract_strided_slice %21 {offsets = [0, 0], sizes = [256, 1], strides = [1, 1]} : vector<256x128xf32> to vector<256x1xf32>
    %cst_17 = arith.constant 0.000000e+00 : f32
    %23 = vector.broadcast %cst_17 : f32 to vector<256x1xf32>
    %24 = arith.subf %23, %22 : vector<256x1xf32>
    %25 = math.exp %24 : vector<256x1xf32>
    %cst_18 = arith.constant 1.000000e+00 : f32
    %26 = vector.broadcast %cst_18 : f32 to vector<256x1xf32>
    %27 = arith.addf %26, %25 : vector<256x1xf32>
    %28 = tpu.reciprocal %27 {approx = true} : vector<256x1xf32> -> vector<256x1xf32>
    %c0_19 = arith.constant 0 : index
    %c0_20 = arith.constant 0 : index
    %29 = vector.load %arg8[%c0_19, %c0_20] : memref<256x1xf32, #tpu.memory_space<vmem>>, vector<256x1xf32>
    tpu.vector_store %arg8[%c0_19, %c0_20], %28 {strides = array<i32>} : memref<256x1xf32, #tpu.memory_space<vmem>>, vector<256x1xf32>,
    return
  }
  func.func @transform_0(%arg0: i32) -> (i32, i32) {
    %c0_i32 = arith.constant 0 : i32
    %c0_i32_0 = arith.constant 0 : i32
    return %arg0, %c0_i32 : i32, i32
  }
  func.func @transform_1(%arg0: i32) -> (i32, i32) {
    %c0_i32 = arith.constant 0 : i32
    %c0_i32_0 = arith.constant 0 : i32
    %c0_i32_1 = arith.constant 0 : i32
    return %c0_i32, %c0_i32_0 : i32, i32
  }
  func.func @transform_2(%arg0: i32) -> (i32, i32) {
    %c0_i32 = arith.constant 0 : i32
    %c0_i32_0 = arith.constant 0 : i32
    %c0_i32_1 = arith.constant 0 : i32
    return %c0_i32, %c0_i32_0 : i32, i32
  }
  func.func @transform_3(%arg0: i32) -> (i32, i32) {
    %c0_i32 = arith.constant 0 : i32
    %c0_i32_0 = arith.constant 0 : i32
    %c0_i32_1 = arith.constant 0 : i32
    return %c0_i32, %c0_i32_0 : i32, i32
  }
  func.func @transform_4(%arg0: i32) -> (i32, i32) {
    %c0_i32 = arith.constant 0 : i32
    %c0_i32_0 = arith.constant 0 : i32
    %c0_i32_1 = arith.constant 0 : i32
    return %c0_i32, %c0_i32_0 : i32, i32
  }
  func.func @transform_5(%arg0: i32) -> (i32, i32) {
    %c0_i32 = arith.constant 0 : i32
    %c0_i32_0 = arith.constant 0 : i32
    %c0_i32_1 = arith.constant 0 : i32
    return %c0_i32, %c0_i32_0 : i32, i32
  }
  func.func @transform_6(%arg0: i32) -> (i32, i32) {
    %c0_i32 = arith.constant 0 : i32
    %c0_i32_0 = arith.constant 0 : i32
    %c0_i32_1 = arith.constant 0 : i32
    return %c0_i32, %c0_i32_0 : i32, i32
  }
  func.func @transform_7(%arg0: i32) -> (i32, i32) {
    %c0_i32 = arith.constant 0 : i32
    %c0_i32_0 = arith.constant 0 : i32
    return %arg0, %c0_i32 : i32, i32
  }
}

</mosaic_0001>

<bundles_post_ra>
// kernel: tpu_custom_call.1
= control target key start
LH: loop header
LB: loop body
LE: loop exit
PB: predicated region body
PF: predicated region fallthrough
CT: control target
= control target key end

     0   :  { %12 = vsyncpa [#allocation3], 0  ;;  %s1744_s0 = inlined_call_operand.hbm [shape: bf16[256,128], index: 0, kind: input, shape index: {}]   ;;  %s1745_s1 = inlined_call_operand.hbm [shape: bf16[128,128], index: 1, kind: input, shape index: {}]   ;;  %s1746_s2 = inlined_call_operand.vmem [shape: f32[1,128], index: 2, kind: input, shape index: {}]   ;;  %s1747_s3 = inlined_call_operand.hbm [shape: bf16[128,128], index: 3, kind: input, shape index: {}]   ;;  %s1748_s4 = inlined_call_operand.vmem [shape: f32[1,128], index: 4, kind: input, shape index: {}]   ;;  %s1749_s5 = inlined_call_operand.hbm [shape: bf16[128,128], index: 5, kind: input, shape index: {}]   ;;  %s1750_s6 = inlined_call_operand.vmem [shape: f32[1,128], index: 6, kind: input, shape index: {}]   ;;  %s1751_s7 = inlined_call_operand.vmem [shape: f32[256,1], index: 7, kind: output, shape index: {}]  }
   0x1   :  { %13 = vsyncpa [#allocation5], 0 }
   0x2   :  { %14 = vsyncpa [#allocation8], 0  ;;  %s32_s26 = sshll.u32 %s1745_s1, 4  ;;  %s1447_s27 = smov [#allocation4]   ;;  %s33_s26 = int_to_ptr.hbm [resolvable:$true] %s32_s26 }
   0x3   :  { %s34_s28 = sshll.u32 %s1447_s27, 4  ;;  %s19_s8 = sshll.u32 %s1744_s0, 4  ;;  %s35_s28 = int_to_ptr.vmem [resolvable:$true] %s34_s28  ;;  %s20_s8 = int_to_ptr.hbm [resolvable:$true] %s19_s8 }
   0x4   :  { %s1448_s9 = smov 64   ;;  %s1449_s10 = smov 4  }
   0x5   :  { %40 = dma.hbm_to_vmem [thread:$0]  %s33_s26, 1024, %s35_s28, [#allocation5], %s1448_s9, %s1448_s9, %s1449_s10  }
   0x6   :  { %s1450_s11 = smov [#allocation2]   ;;  %s47_s15 = sshll.u32 %s1747_s3, 4  ;;  %s48_s15 = int_to_ptr.hbm [resolvable:$true] %s47_s15 }
   0x7   :  { %s21_s12 = sshll.u32 %s1450_s11, 4  ;;  %s62_s17 = sshll.u32 %s1749_s5, 4  ;;  %s22_s12 = int_to_ptr.vmem [resolvable:$true] %s21_s12  ;;  %s63_s17 = int_to_ptr.hbm [resolvable:$true] %s62_s17 }
   0x8   :  { %27 = dma.hbm_to_vmem [thread:$0]  %s20_s8, 2048, %s22_s12, [#allocation3], %s1448_s9, %s1448_s9, %s1449_s10  }
   0x9   :  { %s1451_s18 = smov [#allocation6]   ;;  %s1452_s0 = smov [#allocation7]  }
   0xa   :  { %s49_s19 = sshll.u32 %s1451_s18, 4  ;;  %s64_s20 = sshll.u32 %s1452_s0, 4  ;;  %s50_s19 = int_to_ptr.vmem [resolvable:$true] %s49_s19  ;;  %s65_s20 = int_to_ptr.vmem [resolvable:$true] %s64_s20 }
   0xb   :  { %55 = dma.hbm_to_vmem [thread:$0]  %s48_s15, 1024, %s50_s19, [#allocation5], %s1448_s9, %s1448_s9, %s1449_s10  }
   0xc   :  { %70 = dma.hbm_to_vmem [thread:$0]  %s63_s17, 1024, %s65_s20, [#allocation8], %s1448_s9, %s1448_s9, %s1449_s10  }
   0xd   :  { %1441 = dma.done.wait [#allocation3], 2048  }
   0xe   :  { %1442 = vsyncadd [#allocation3], 4294965248 }
   0xf   :  { %1443 = dma.done.wait [#allocation5], 2048  }
  0x10   :  { %1444 = vsyncadd [#allocation5], 4294965248 }
  0x11   :  { %1445 = dma.done.wait [#allocation8], 1024  }
  0x12   :  { %1446 = vsyncadd [#allocation8], 4294966272  ;;  %v1167_v0 = vld [vmem:[#allocation4 + $0x38] sm:$0xff]  ;;  %v1166_v1 = vld [vmem:[#allocation4 + $0x30] sm:$0xff]  ;;  %vm944_vm0 = vcmask 7168  }
  0x13   :  { %285 = vmatpush.bf16.msra.mxu0 %v1167_v0  ;;  %1184 = vmatpush.bf16.msra.mxu3 %v1167_v0  ;;  %v1165_v2 = vld [vmem:[#allocation4 + $0x28] sm:$0xff]  ;;  %v1164_v3 = vld [vmem:[#allocation4 + $0x20] sm:$0xff]  ;;  %v1163_v4 = vld [vmem:[#allocation4 + $0x18] sm:$0xff] }
  0x14   :  { %v1162_v5 = vld [vmem:[#allocation4 + $0x10] sm:$0xff]  ;;  %v1161_v6 = vld [vmem:[#allocation4 + $0x8] sm:$0xff]  ;;  %v1160_v7 = vld [vmem:[#allocation4] sm:$0xff] }
  0x15   :  { %v1144_v8 = vld [vmem:[#allocation2] sm:$0xff]  ;;  %v1145_v9 = vld [vmem:[#allocation2 + $0x8] sm:$0xff]  ;;  %v1146_v10 = vld [vmem:[#allocation2 + $0x10] sm:$0xff] }
  0x16   :  { %v1147_v11 = vld [vmem:[#allocation2 + $0x18] sm:$0xff]  ;;  %v1156_v12 = vld [vmem:[#allocation2 + $0x60] sm:$0xff]  ;;  %v1157_v14 = vld [vmem:[#allocation2 + $0x68] sm:$0xff] }
  0x17   :  { %286 = vmatpush.bf16.msra.mxu0 %v1166_v1  ;;  %1185 = vmatpush.bf16.msra.mxu3 %v1166_v1  ;;  %v1148_v13 = vld [vmem:[#allocation2 + $0x20] sm:$0xff]  ;;  %v1175_v15 = vld [vmem:[#allocation6 + $0x38] sm:$0xff]  ;;  %v1149_v16 = vld [vmem:[#allocation2 + $0x28] sm:$0xff] }
  0x18   :  { %490 = vmatpush.bf16.msra.mxu1 %v1175_v15  ;;  %v1174_v17 = vld [vmem:[#allocation6 + $0x30] sm:$0xff]  ;;  %v1173_v19 = vld [vmem:[#allocation6 + $0x28] sm:$0xff]  ;;  %v1172_v20 = vld [vmem:[#allocation6 + $0x20] sm:$0xff] }
  0x19   :  { %v1158_v18 = vld [vmem:[#allocation2 + $0x70] sm:$0xff]  ;;  %v1171_v21 = vld [vmem:[#allocation6 + $0x18] sm:$0xff]  ;;  %v1169_v24 = vld [vmem:[#allocation6 + $0x8] sm:$0xff] }
  0x1a   :  { %v1150_v22 = vld [vmem:[#allocation2 + $0x30] sm:$0xff]  ;;  %v1168_v25 = vld [vmem:[#allocation6] sm:$0xff]  ;;  %v1159_v26 = vld [vmem:[#allocation2 + $0x78] sm:$0xff] }
  0x1b   :  { %287 = vmatpush.bf16.msra.mxu0 %v1165_v2  ;;  %1186 = vmatpush.bf16.msra.mxu3 %v1165_v2  ;;  %v1170_v23 = vld [vmem:[#allocation6 + $0x10] sm:$0xff]  ;;  %v1151_v27 = vld [vmem:[#allocation2 + $0x38] sm:$0xff]  ;;  %v1152_v28 = vld [vmem:[#allocation2 + $0x40] sm:$0xff] }
  0x1c   :  { %491 = vmatpush.bf16.msra.mxu1 %v1174_v17  ;;  %v1508_v30 = vld [vmem:[%s1746_s2] ss:$0 sm:$0xff]  ;;  %v1153_v37 = vld [vmem:[#allocation2 + $0x48] sm:$0xff]  ;;  %v1154_v45 = vld [vmem:[#allocation2 + $0x50] sm:$0xff] }
  0x1d   :  { %v1155_v53 = vld [vmem:[#allocation2 + $0x58] sm:$0xff] }
  0x1f   :  { %288 = vmatpush.bf16.msra.mxu0 %v1164_v3  ;;  %1187 = vmatpush.bf16.msra.mxu3 %v1164_v3 }
  0x20   :  { %492 = vmatpush.bf16.msra.mxu1 %v1173_v19 }
  0x23   :  { %289 = vmatpush.bf16.msra.mxu0 %v1163_v4  ;;  %1188 = vmatpush.bf16.msra.mxu3 %v1163_v4 }
  0x24   :  { %493 = vmatpush.bf16.msra.mxu1 %v1172_v20 }
  0x27   :  { %290 = vmatpush.bf16.msra.mxu0 %v1162_v5  ;;  %1189 = vmatpush.bf16.msra.mxu3 %v1162_v5 }
  0x28   :  { %494 = vmatpush.bf16.msra.mxu1 %v1171_v21 }
  0x2b   :  { %291 = vmatpush.bf16.msra.mxu0 %v1161_v6  ;;  %1190 = vmatpush.bf16.msra.mxu3 %v1161_v6 }
  0x2c   :  { %495 = vmatpush.bf16.msra.mxu1 %v1170_v23 }
  0x2f   :  { %292 = vmatpush.bf16.msra.mxu0 %v1160_v7  ;;  %1191 = vmatpush.bf16.msra.mxu3 %v1160_v7 }
  0x30   :  { %496 = vmatpush.bf16.msra.mxu1 %v1169_v24 }
  0x32   :  { %293 = vmatmul.bf16.vlgmr.msra.gmra.mxu0 %v1144_v8  ;;  %353 = vmatmul.bf16.vlgmr.msra.gmra.mxu3 %v1156_v12 }
  0x33   :  { %1192 = vmatpush.bf16.msrb.mxu3 %v1175_v15 }
  0x34   :  { %497 = vmatpush.bf16.msra.mxu1 %v1168_v25 }
  0x37   :  { %1193 = vmatpush.bf16.msrb.mxu3 %v1174_v17 }
  0x3b   :  { %1194 = vmatpush.bf16.msrb.mxu3 %v1173_v19 }
  0x3f   :  { %1195 = vmatpush.bf16.msrb.mxu3 %v1172_v20 }
  0x42   :  { %298 = vmatmul.bf16.gmra.mxu0 %v1145_v9  ;;  %358 = vmatmul.bf16.gmra.mxu3 %v1157_v14 }
  0x43   :  { %1196 = vmatpush.bf16.msrb.mxu3 %v1171_v21 }
  0x47   :  { %1197 = vmatpush.bf16.msrb.mxu3 %v1170_v23 }
  0x4b   :  { %1198 = vmatpush.bf16.msrb.mxu3 %v1169_v24 }
  0x4f   :  { %1199 = vmatpush.bf16.msrb.mxu3 %v1168_v25  ;;  %v1182_v25 = vld [vmem:[#allocation7 + $0x30] sm:$0xff] }
  0x52   :  { %303 = vmatmul.bf16.gmra.mxu0 %v1146_v10  ;;  %363 = vmatmul.bf16.gmra.mxu3 %v1158_v18  ;;  %v1183_v18 = vld [vmem:[#allocation7 + $0x38] sm:$0xff] }
  0x53   :  { %695 = vmatpush.bf16.msra.mxu2 %v1183_v18  ;;  %1200 = vmatpush.bf16.msra.mxu3 %v1183_v18 }
  0x57   :  { %696 = vmatpush.bf16.msra.mxu2 %v1182_v25  ;;  %1201 = vmatpush.bf16.msra.mxu3 %v1182_v25 }
  0x62   :  { %308 = vmatmul.bf16.gmra.mxu0 %v1147_v11  ;;  %368 = vmatmul.bf16.gmra.mxu3 %v1159_v26 }
  0x72   :  { %313 = vmatmul.bf16.gmra.mxu0 %v1148_v13 }
  0x82   :  { %318 = vmatmul.bf16.gmra.mxu0 %v1149_v16 }
  0x92   :  { %323 = vmatmul.bf16.gmra.mxu0 %v1150_v22 }
  0xa2   :  { %328 = vmatmul.bf16.gmra.mxu0 %v1151_v27 }
  0xaf   :  { %v294_v29 = vpop.f32.mrf.mxu0 }
  0xb0   :  { %v295_v31 = vadd.f32 %v1508_v30, %v294_v29  ;;  %v1181_v29 = vld [vmem:[#allocation7 + $0x28] sm:$0xff] }
  0xb1   :  { %697 = vmatpush.bf16.msra.mxu2 %v1181_v29  ;;  %1202 = vmatpush.bf16.msra.mxu3 %v1181_v29 }
  0xb2   :  { %333 = vmatmul.bf16.gmra.mxu0 %v1152_v28  ;;  %v374_v34 = vmax.f32 %v295_v31, 0.0  ;;  %v1180_v31 = vld [vmem:[#allocation7 + $0x20] sm:$0xff] }
  0xb5   :  { %v354_v62 = vpop.f32.mrf.mxu3  ;;  %698 = vmatpush.bf16.msra.mxu2 %v1180_v31  ;;  %1203 = vmatpush.bf16.msra.mxu3 %v1180_v31 }
  0xb6   :  { %v355_v0 = vadd.f32 %v1508_v30, %v354_v62 }
  0xb7   :  { %v296_v32 = vpop.f32.mrf.mxu0 }
  0xb8   :  { %v297_v33 = vadd.f32 %v1508_v30, %v296_v32  ;;  %v398_v6 = vmax.f32 %v355_v0, 0.0 }
  0xba   :  { %v375_v35 = vmax.f32 %v297_v33, 0.0 }
  0xbc   :  { %v406_v36 = vpack.c.bf16 %v375_v35, %v374_v34 }
  0xbd   :  { %v356_v3 = vpop.f32.mrf.mxu3 }
  0xbe   :  { %498 = vmatmul.bf16.vlgmr.msra.gmra.mxu1 %v406_v36  ;;  %v357_v7 = vadd.f32 %v1508_v30, %v356_v3 }
  0xbf   :  { %v299_v38 = vpop.f32.mrf.mxu0 }
  0xc0   :  { %v300_v39 = vadd.f32 %v1508_v30, %v299_v38  ;;  %v399_v9 = vmax.f32 %v357_v7, 0.0 }
  0xc2   :  { %338 = vmatmul.bf16.gmra.mxu0 %v1153_v37  ;;  %v376_v42 = vmax.f32 %v300_v39, 0.0  ;;  %v418_v10 = vpack.c.bf16 %v399_v9, %v398_v6  ;;  %v1179_v37 = vld [vmem:[#allocation7 + $0x18] sm:$0xff]  ;;  %v1539_v6 = vld [vmem:[%s1748_s4] ss:$0 sm:$0xff] }
  0xc3   :  { %699 = vmatpush.bf16.msra.mxu2 %v1179_v37  ;;  %1204 = vmatpush.bf16.msra.mxu3 %v1179_v37 }
  0xc4   :  { %558 = vmatmul.bf16.vlgmr.msrb.gmra.mxu3 %v418_v10 }
  0xc5   :  { %v359_v12 = vpop.f32.mrf.mxu3 }
  0xc6   :  { %v360_v14 = vadd.f32 %v1508_v30, %v359_v12 }
  0xc7   :  { %v301_v40 = vpop.f32.mrf.mxu0 }
  0xc8   :  { %v302_v41 = vadd.f32 %v1508_v30, %v301_v40  ;;  %v400_v21 = vmax.f32 %v360_v14, 0.0 }
  0xca   :  { %v377_v43 = vmax.f32 %v302_v41, 0.0 }
  0xcc   :  { %v407_v44 = vpack.c.bf16 %v377_v43, %v376_v42 }
  0xcd   :  { %v361_v17 = vpop.f32.mrf.mxu3 }
  0xce   :  { %503 = vmatmul.bf16.gmra.mxu1 %v407_v44  ;;  %v362_v22 = vadd.f32 %v1508_v30, %v361_v17  ;;  %v1178_v44 = vld [vmem:[#allocation7 + $0x10] sm:$0xff] }
  0xcf   :  { %v304_v46 = vpop.f32.mrf.mxu0  ;;  %700 = vmatpush.bf16.msra.mxu2 %v1178_v44  ;;  %1205 = vmatpush.bf16.msra.mxu3 %v1178_v44 }
  0xd0   :  { %v305_v47 = vadd.f32 %v1508_v30, %v304_v46  ;;  %v401_v24 = vmax.f32 %v362_v22, 0.0 }
  0xd2   :  { %343 = vmatmul.bf16.gmra.mxu0 %v1154_v45  ;;  %v378_v50 = vmax.f32 %v305_v47, 0.0  ;;  %v419_v26 = vpack.c.bf16 %v401_v24, %v400_v21 }
  0xd4   :  { %563 = vmatmul.bf16.gmra.mxu3 %v419_v26 }
  0xd5   :  { %v364_v28 = vpop.f32.mrf.mxu3 }
  0xd6   :  { %v365_v33 = vadd.f32 %v1508_v30, %v364_v28 }
  0xd7   :  { %v306_v48 = vpop.f32.mrf.mxu0 }
  0xd8   :  { %v307_v49 = vadd.f32 %v1508_v30, %v306_v48  ;;  %v402_v40 = vmax.f32 %v365_v33, 0.0  ;;  %v1177_v48 = vld [vmem:[#allocation7 + $0x8] sm:$0xff] }
  0xd9   :  { %701 = vmatpush.bf16.msra.mxu2 %v1177_v48  ;;  %1206 = vmatpush.bf16.msra.mxu3 %v1177_v48 }
  0xda   :  { %v379_v51 = vmax.f32 %v307_v49, 0.0  ;;  %v1176_v49 = vld [vmem:[#allocation7] sm:$0xff] }
  0xdc   :  { %v408_v52 = vpack.c.bf16 %v379_v51, %v378_v50 }
  0xdd   :  { %v366_v36 = vpop.f32.mrf.mxu3  ;;  %702 = vmatpush.bf16.msra.mxu2 %v1176_v49  ;;  %1207 = vmatpush.bf16.msra.mxu3 %v1176_v49 }
  0xde   :  { %508 = vmatmul.bf16.gmra.mxu1 %v408_v52  ;;  %v367_v41 = vadd.f32 %v1508_v30, %v366_v36 }
  0xdf   :  { %v309_v54 = vpop.f32.mrf.mxu0 }
  0xe0   :  { %v310_v55 = vadd.f32 %v1508_v30, %v309_v54  ;;  %v403_v43 = vmax.f32 %v367_v41, 0.0 }
  0xe2   :  { %348 = vmatmul.bf16.gmra.mxu0 %v1155_v53  ;;  %v380_v58 = vmax.f32 %v310_v55, 0.0  ;;  %v420_v45 = vpack.c.bf16 %v403_v43, %v402_v40 }
  0xe4   :  { %568 = vmatmul.bf16.gmra.mxu3 %v420_v45 }
  0xe5   :  { %v369_v47 = vpop.f32.mrf.mxu3 }
  0xe6   :  { %v370_v51 = vadd.f32 %v1508_v30, %v369_v47 }
  0xe7   :  { %v311_v56 = vpop.f32.mrf.mxu0 }
  0xe8   :  { %v312_v57 = vadd.f32 %v1508_v30, %v311_v56 }
  0xea   :  { %v381_v59 = vmax.f32 %v312_v57, 0.0  ;;  %v404_v57 = vmax.f32 %v370_v51, 0.0 }
  0xec   :  { %v409_v60 = vpack.c.bf16 %v381_v59, %v380_v58 }
  0xed   :  { %v371_v54 = vpop.f32.mrf.mxu3 }
  0xee   :  { %513 = vmatmul.bf16.gmra.mxu1 %v409_v60  ;;  %v372_v58 = vadd.f32 %v1508_v30, %v371_v54 }
  0xef   :  { %v314_v61 = vpop.f32.mrf.mxu0 }
  0xf0   :  { %v315_v63 = vadd.f32 %v1508_v30, %v314_v61  ;;  %v405_v60 = vmax.f32 %v372_v58, 0.0 }
  0xf2   :  { %v382_v4 = vmax.f32 %v315_v63, 0.0  ;;  %v421_v61 = vpack.c.bf16 %v405_v60, %v404_v57 }
  0xf4   :  { %573 = vmatmul.bf16.gmra.mxu3 %v421_v61 }
  0xf7   :  { %v316_v1 = vpop.f32.mrf.mxu0 }
  0xf8   :  { %v317_v2 = vadd.f32 %v1508_v30, %v316_v1 }
  0xfa   :  { %v383_v5 = vmax.f32 %v317_v2, 0.0 }
  0xfc   :  { %v410_v8 = vpack.c.bf16 %v383_v5, %v382_v4 }
  0xfe   :  { %518 = vmatmul.bf16.gmra.mxu1 %v410_v8 }
  0xff   :  { %v319_v11 = vpop.f32.mrf.mxu0 }
 0x100   :  { %v320_v13 = vadd.f32 %v1508_v30, %v319_v11 }
 0x102   :  { %v384_v19 = vmax.f32 %v320_v13, 0.0 }
 0x107   :  { %v321_v15 = vpop.f32.mrf.mxu0 }
 0x108   :  { %v322_v16 = vadd.f32 %v1508_v30, %v321_v15 }
 0x10a   :  { %v385_v20 = vmax.f32 %v322_v16, 0.0 }
 0x10c   :  { %v411_v23 = vpack.c.bf16 %v385_v20, %v384_v19 }
 0x10e   :  { %523 = vmatmul.bf16.gmra.mxu1 %v411_v23 }
 0x10f   :  { %v324_v27 = vpop.f32.mrf.mxu0 }
 0x110   :  { %v325_v32 = vadd.f32 %v1508_v30, %v324_v27 }
 0x112   :  { %v386_v38 = vmax.f32 %v325_v32, 0.0 }
 0x117   :  { %v326_v34 = vpop.f32.mrf.mxu0 }
 0x118   :  { %v327_v35 = vadd.f32 %v1508_v30, %v326_v34 }
 0x11a   :  { %v387_v39 = vmax.f32 %v327_v35, 0.0 }
 0x11c   :  { %v412_v42 = vpack.c.bf16 %v387_v39, %v386_v38 }
 0x11e   :  { %528 = vmatmul.bf16.gmra.mxu1 %v412_v42 }
 0x11f   :  { %v329_v46 = vpop.f32.mrf.mxu0 }
 0x120   :  { %v330_v50 = vadd.f32 %v1508_v30, %v329_v46 }
 0x122   :  { %v388_v55 = vmax.f32 %v330_v50, 0.0 }
 0x127   :  { %v331_v52 = vpop.f32.mrf.mxu0 }
 0x128   :  { %v332_v53 = vadd.f32 %v1508_v30, %v331_v52 }
 0x12a   :  { %v389_v56 = vmax.f32 %v332_v53, 0.0 }
 0x12c   :  { %v413_v59 = vpack.c.bf16 %v389_v56, %v388_v55 }
 0x12e   :  { %533 = vmatmul.bf16.gmra.mxu1 %v413_v59 }
 0x12f   :  { %v334_v62 = vpop.f32.mrf.mxu0 }
 0x130   :  { %v335_v63 = vadd.f32 %v1508_v30, %v334_v62 }
 0x132   :  { %v390_v2 = vmax.f32 %v335_v63, 0.0 }
 0x137   :  { %v336_v0 = vpop.f32.mrf.mxu0 }
 0x138   :  { %v337_v1 = vadd.f32 %v1508_v30, %v336_v0 }
 0x13a   :  { %v391_v3 = vmax.f32 %v337_v1, 0.0 }
 0x13b   :  { %v499_v4 = vpop.f32.mrf.mxu1 }
 0x13c   :  { %v414_v5 = vpack.c.bf16 %v391_v3, %v390_v2  ;;  %v500_v8 = vadd.f32 %v1539_v6, %v499_v4 }
 0x13e   :  { %538 = vmatmul.bf16.gmra.mxu1 %v414_v5  ;;  %v579_v11 = vmax.f32 %v500_v8, 0.0 }
 0x13f   :  { %v339_v7 = vpop.f32.mrf.mxu0 }
 0x140   :  { %v340_v12 = vadd.f32 %v1508_v30, %v339_v7 }
 0x142   :  { %v392_v17 = vmax.f32 %v340_v12, 0.0 }
 0x143   :  { %v501_v9 = vpop.f32.mrf.mxu1 }
 0x144   :  { %v502_v10 = vadd.f32 %v1539_v6, %v501_v9 }
 0x146   :  { %v580_v13 = vmax.f32 %v502_v10, 0.0 }
 0x147   :  { %v341_v14 = vpop.f32.mrf.mxu0  ;;  %v559_v58 = vpop.f32.mrf.mxu3 }
 0x148   :  { %v342_v15 = vadd.f32 %v1508_v30, %v341_v14  ;;  %v611_v16 = vpack.c.bf16 %v580_v13, %v579_v11  ;;  %v560_v63 = vadd.f32 %v1539_v6, %v559_v58 }
 0x14a   :  { %v393_v18 = vmax.f32 %v342_v15, 0.0  ;;  %703 = vmatmul.bf16.vlgmr.msra.gmra.mxu2 %v611_v16  ;;  %v603_v2 = vmax.f32 %v560_v63, 0.0 }
 0x14b   :  { %v504_v19 = vpop.f32.mrf.mxu1 }
 0x14c   :  { %v415_v20 = vpack.c.bf16 %v393_v18, %v392_v17  ;;  %v505_v22 = vadd.f32 %v1539_v6, %v504_v19 }
 0x14e   :  { %543 = vmatmul.bf16.gmra.mxu1 %v415_v20  ;;  %v581_v25 = vmax.f32 %v505_v22, 0.0 }
 0x14f   :  { %v344_v21 = vpop.f32.mrf.mxu0  ;;  %v561_v1 = vpop.f32.mrf.mxu3 }
 0x150   :  { %v345_v26 = vadd.f32 %v1508_v30, %v344_v21  ;;  %v562_v3 = vadd.f32 %v1539_v6, %v561_v1 }
 0x152   :  { %v394_v32 = vmax.f32 %v345_v26, 0.0  ;;  %v604_v4 = vmax.f32 %v562_v3, 0.0 }
 0x153   :  { %v506_v23 = vpop.f32.mrf.mxu1 }
 0x154   :  { %v507_v24 = vadd.f32 %v1539_v6, %v506_v23  ;;  %v623_v5 = vpack.c.bf16 %v604_v4, %v603_v2 }
 0x156   :  { %v582_v27 = vmax.f32 %v507_v24, 0.0  ;;  %763 = vmatmul.bf16.vlgmr.msra.gmra.mxu3 %v623_v5 }
 0x157   :  { %v346_v28 = vpop.f32.mrf.mxu0  ;;  %v564_v9 = vpop.f32.mrf.mxu3 }
 0x158   :  { %v347_v29 = vadd.f32 %v1508_v30, %v346_v28  ;;  %v612_v31 = vpack.c.bf16 %v582_v27, %v581_v25  ;;  %v565_v14 = vadd.f32 %v1539_v6, %v564_v9 }
 0x15a   :  { %v395_v33 = vmax.f32 %v347_v29, 0.0  ;;  %708 = vmatmul.bf16.gmra.mxu2 %v612_v31  ;;  %v605_v17 = vmax.f32 %v565_v14, 0.0 }
 0x15b   :  { %v509_v34 = vpop.f32.mrf.mxu1 }
 0x15c   :  { %v416_v35 = vpack.c.bf16 %v395_v33, %v394_v32  ;;  %v510_v37 = vadd.f32 %v1539_v6, %v509_v34 }
 0x15e   :  { %548 = vmatmul.bf16.gmra.mxu1 %v416_v35  ;;  %v583_v40 = vmax.f32 %v510_v37, 0.0 }
 0x15f   :  { %v349_v36 = vpop.f32.mrf.mxu0  ;;  %v566_v16 = vpop.f32.mrf.mxu3 }
 0x160   :  { %v350_v41 = vadd.f32 %v1508_v30, %v349_v36  ;;  %v567_v18 = vadd.f32 %v1539_v6, %v566_v16 }
 0x162   :  { %v396_v46 = vmax.f32 %v350_v41, 0.0  ;;  %v606_v19 = vmax.f32 %v567_v18, 0.0 }
 0x163   :  { %v511_v38 = vpop.f32.mrf.mxu1 }
 0x164   :  { %v512_v39 = vadd.f32 %v1539_v6, %v511_v38  ;;  %v624_v20 = vpack.c.bf16 %v606_v19, %v605_v17 }
 0x166   :  { %v584_v42 = vmax.f32 %v512_v39, 0.0  ;;  %768 = vmatmul.bf16.gmra.mxu3 %v624_v20 }
 0x167   :  { %v351_v43 = vpop.f32.mrf.mxu0  ;;  %v569_v23 = vpop.f32.mrf.mxu3 }
 0x168   :  { %v352_v44 = vadd.f32 %v1508_v30, %v351_v43  ;;  %v613_v45 = vpack.c.bf16 %v584_v42, %v583_v40  ;;  %v570_v28 = vadd.f32 %v1539_v6, %v569_v23 }
 0x16a   :  { %v397_v47 = vmax.f32 %v352_v44, 0.0  ;;  %713 = vmatmul.bf16.gmra.mxu2 %v613_v45  ;;  %v607_v32 = vmax.f32 %v570_v28, 0.0 }
 0x16b   :  { %v514_v48 = vpop.f32.mrf.mxu1 }
 0x16c   :  { %v417_v49 = vpack.c.bf16 %v397_v47, %v396_v46  ;;  %v515_v50 = vadd.f32 %v1539_v6, %v514_v48 }
 0x16e   :  { %553 = vmatmul.bf16.gmra.mxu1 %v417_v49  ;;  %v585_v53 = vmax.f32 %v515_v50, 0.0 }
 0x16f   :  { %v571_v31 = vpop.f32.mrf.mxu3 }
 0x170   :  { %v572_v33 = vadd.f32 %v1539_v6, %v571_v31 }
 0x172   :  { %v608_v34 = vmax.f32 %v572_v33, 0.0 }
 0x173   :  { %v516_v51 = vpop.f32.mrf.mxu1 }
 0x174   :  { %v517_v52 = vadd.f32 %v1539_v6, %v516_v51  ;;  %v625_v35 = vpack.c.bf16 %v608_v34, %v607_v32 }
 0x176   :  { %v586_v54 = vmax.f32 %v517_v52, 0.0  ;;  %773 = vmatmul.bf16.gmra.mxu3 %v625_v35 }
 0x177   :  { %v574_v38 = vpop.f32.mrf.mxu3 }
 0x178   :  { %v614_v55 = vpack.c.bf16 %v586_v54, %v585_v53  ;;  %v575_v45 = vadd.f32 %v1539_v6, %v574_v38 }
 0x17a   :  { %718 = vmatmul.bf16.gmra.mxu2 %v614_v55  ;;  %v609_v47 = vmax.f32 %v575_v45, 0.0 }
 0x17b   :  { %v519_v56 = vpop.f32.mrf.mxu1 }
 0x17c   :  { %v520_v57 = vadd.f32 %v1539_v6, %v519_v56  ;;  %v1576_v56 = vld [vmem:[%s1750_s6] ss:$0 sm:$0xff] }
 0x17e   :  { %v587_v60 = vmax.f32 %v520_v57, 0.0 }
 0x17f   :  { %v576_v44 = vpop.f32.mrf.mxu3 }
 0x180   :  { %v577_v46 = vadd.f32 %v1539_v6, %v576_v44 }
 0x182   :  { %v610_v48 = vmax.f32 %v577_v46, 0.0 }
 0x183   :  { %v521_v30 = vpop.f32.mrf.mxu1 }
 0x184   :  { %v522_v59 = vadd.f32 %v1539_v6, %v521_v30  ;;  %v626_v49 = vpack.c.bf16 %v610_v48, %v609_v47 }
 0x186   :  { %v588_v61 = vmax.f32 %v522_v59, 0.0  ;;  %778 = vmatmul.bf16.gmra.mxu3 %v626_v49 }
 0x188   :  { %v615_v62 = vpack.c.bf16 %v588_v61, %v587_v60 }
 0x18a   :  { %723 = vmatmul.bf16.gmra.mxu2 %v615_v62 }
 0x18b   :  { %v524_v0 = vpop.f32.mrf.mxu1 }
 0x18c   :  { %v525_v7 = vadd.f32 %v1539_v6, %v524_v0 }
 0x18e   :  { %v589_v11 = vmax.f32 %v525_v7, 0.0 }
 0x193   :  { %v526_v8 = vpop.f32.mrf.mxu1 }
 0x194   :  { %v527_v10 = vadd.f32 %v1539_v6, %v526_v8 }
 0x196   :  { %v590_v12 = vmax.f32 %v527_v10, 0.0 }
 0x198   :  { %v616_v13 = vpack.c.bf16 %v590_v12, %v589_v11 }
 0x19a   :  { %728 = vmatmul.bf16.gmra.mxu2 %v616_v13 }
 0x19b   :  { %v529_v15 = vpop.f32.mrf.mxu1 }
 0x19c   :  { %v530_v21 = vadd.f32 %v1539_v6, %v529_v15 }
 0x19e   :  { %v591_v25 = vmax.f32 %v530_v21, 0.0 }
 0x1a3   :  { %v531_v22 = vpop.f32.mrf.mxu1 }
 0x1a4   :  { %v532_v24 = vadd.f32 %v1539_v6, %v531_v22 }
 0x1a6   :  { %v592_v26 = vmax.f32 %v532_v24, 0.0 }
 0x1a8   :  { %v617_v27 = vpack.c.bf16 %v592_v26, %v591_v25 }
 0x1aa   :  { %733 = vmatmul.bf16.gmra.mxu2 %v617_v27 }
 0x1ab   :  { %v534_v29 = vpop.f32.mrf.mxu1 }
 0x1ac   :  { %v535_v36 = vadd.f32 %v1539_v6, %v534_v29 }
 0x1ae   :  { %v593_v40 = vmax.f32 %v535_v36, 0.0 }
 0x1b3   :  { %v536_v37 = vpop.f32.mrf.mxu1 }
 0x1b4   :  { %v537_v39 = vadd.f32 %v1539_v6, %v536_v37 }
 0x1b6   :  { %v594_v41 = vmax.f32 %v537_v39, 0.0 }
 0x1b8   :  { %v618_v42 = vpack.c.bf16 %v594_v41, %v593_v40 }
 0x1ba   :  { %738 = vmatmul.bf16.gmra.mxu2 %v618_v42 }
 0x1bb   :  { %v539_v43 = vpop.f32.mrf.mxu1 }
 0x1bc   :  { %v540_v50 = vadd.f32 %v1539_v6, %v539_v43 }
 0x1be   :  { %v595_v53 = vmax.f32 %v540_v50, 0.0 }
 0x1c3   :  { %v541_v51 = vpop.f32.mrf.mxu1 }
 0x1c4   :  { %v542_v52 = vadd.f32 %v1539_v6, %v541_v51 }
 0x1c6   :  { %v596_v54 = vmax.f32 %v542_v52, 0.0 }
 0x1c8   :  { %v619_v55 = vpack.c.bf16 %v596_v54, %v595_v53 }
 0x1ca   :  { %743 = vmatmul.bf16.gmra.mxu2 %v619_v55 }
 0x1cb   :  { %v544_v57 = vpop.f32.mrf.mxu1 }
 0x1cc   :  { %v545_v60 = vadd.f32 %v1539_v6, %v544_v57 }
 0x1cd   :  { %v704_v30 = vpop.f32.mrf.mxu2 }
 0x1ce   :  { %v705_v58 = vadd.f32 %v1576_v56, %v704_v30  ;;  %v597_v1 = vmax.f32 %v545_v60, 0.0 }
 0x1d0   :  { %v784_v59 = vsub.f32 0.0, %v705_v58 }
 0x1d2   :  { %v816_v61 = vmul.f32 1.442695, %v784_v59 }
 0x1d3   :  { %v546_v62 = vpop.f32.mrf.mxu1 }
 0x1d4   :  { %1217 = vpow2.f32 %v816_v61  ;;  %v547_v63 = vadd.f32 %v1539_v6, %v546_v62 }
 0x1d5   :  { %v706_v0 = vpop.f32.mrf.mxu2 }
 0x1d6   :  { %v598_v2 = vmax.f32 %v547_v63, 0.0  ;;  %v707_v3 = vadd.f32 %v1576_v56, %v706_v0 }
 0x1d8   :  { %v785_v4 = vsub.f32 0.0, %v707_v3  ;;  %v620_v5 = vpack.c.bf16 %v598_v2, %v597_v1 }
 0x1da   :  { %v1218_v7 = vpop.eup %1217  ;;  %v818_v8 = vmul.f32 1.442695, %v785_v4  ;;  %748 = vmatmul.bf16.gmra.mxu2 %v620_v5 }
 0x1db   :  { %v880_v9 = vadd.f32 1.0, %v1218_v7  ;;  %v549_v10 = vpop.f32.mrf.mxu1 }
 0x1dc   :  { %1219 = vpow2.f32 %v818_v8  ;;  %v550_v15 = vadd.f32 %v1539_v6, %v549_v10 }
 0x1dd   :  { %1221 = vrcp.f32 %v880_v9  ;;  %v709_v11 = vpop.f32.mrf.mxu2 }
 0x1de   :  { %v710_v12 = vadd.f32 %v1576_v56, %v709_v11  ;;  %v599_v22 = vmax.f32 %v550_v15, 0.0  ;;  %v764_v11 = vpop.f32.mrf.mxu3 }
 0x1e0   :  { %v786_v13 = vsub.f32 0.0, %v710_v12 }
 0x1e2   :  { %v1220_v14 = vpop.eup %1219  ;;  %v820_v16 = vmul.f32 1.442695, %v786_v13 }
 0x1e3   :  { %v1222_v17 = vpop.eup %1221  ;;  %v881_v18 = vadd.f32 1.0, %v1220_v14  ;;  %v551_v19 = vpop.f32.mrf.mxu1 }
 0x1e4   :  { %945 = vst.msk [vmem:[%s1751_s7] sm:$0xff] %vm944_vm0, %v1222_v17  ;;  %1223 = vpow2.f32 %v820_v16  ;;  %v552_v20 = vadd.f32 %v1539_v6, %v551_v19 }
 0x1e5   :  { %1225 = vrcp.f32 %v881_v18  ;;  %v711_v21 = vpop.f32.mrf.mxu2 }
 0x1e6   :  { %v600_v23 = vmax.f32 %v552_v20, 0.0  ;;  %v712_v24 = vadd.f32 %v1576_v56, %v711_v21  ;;  %v766_v19 = vpop.f32.mrf.mxu3  ;;  %v765_v21 = vadd.f32 %v1576_v56, %v764_v11 }
 0x1e8   :  { %v787_v25 = vsub.f32 0.0, %v712_v24  ;;  %v621_v26 = vpack.c.bf16 %v600_v23, %v599_v22  ;;  %v767_v22 = vadd.f32 %v1576_v56, %v766_v19  ;;  %v808_v24 = vsub.f32 0.0, %v765_v21 }
 0x1ea   :  { %v1224_v27 = vpop.eup %1223  ;;  %v822_v28 = vmul.f32 1.442695, %v787_v25  ;;  %753 = vmatmul.bf16.gmra.mxu2 %v621_v26  ;;  %v809_v25 = vsub.f32 0.0, %v767_v22 }
 0x1eb   :  { %v1226_v29 = vpop.eup %1225  ;;  %v882_v31 = vadd.f32 1.0, %v1224_v27  ;;  %v554_v32 = vpop.f32.mrf.mxu1 }
 0x1ec   :  { %946 = vst.msk [vmem:[%s1751_s7 + $0x8] sm:$0xff] %vm944_vm0, %v1226_v29  ;;  %1227 = vpow2.f32 %v822_v28  ;;  %v555_v37 = vadd.f32 %v1539_v6, %v554_v32  ;;  %v864_v28 = vmul.f32 1.442695, %v808_v24  ;;  %v866_v32 = vmul.f32 1.442695, %v809_v25 }
 0x1ed   :  { %1229 = vrcp.f32 %v882_v31  ;;  %v714_v33 = vpop.f32.mrf.mxu2 }
 0x1ee   :  { %v715_v34 = vadd.f32 %v1576_v56, %v714_v33  ;;  %v601_v44 = vmax.f32 %v555_v37, 0.0 }
 0x1f0   :  { %v788_v35 = vsub.f32 0.0, %v715_v34  ;;  %v769_v34 = vpop.f32.mrf.mxu3 }
 0x1f2   :  { %v1228_v36 = vpop.eup %1227  ;;  %v824_v38 = vmul.f32 1.442695, %v788_v35 }
 0x1f3   :  { %v1230_v39 = vpop.eup %1229  ;;  %v883_v40 = vadd.f32 1.0, %v1228_v36  ;;  %v556_v41 = vpop.f32.mrf.mxu1 }
 0x1f4   :  { %947 = vst.msk [vmem:[%s1751_s7 + $0x10] sm:$0xff] %vm944_vm0, %v1230_v39  ;;  %1231 = vpow2.f32 %v824_v38  ;;  %v557_v42 = vadd.f32 %v1539_v6, %v556_v41 }
 0x1f5   :  { %1233 = vrcp.f32 %v883_v40  ;;  %v716_v43 = vpop.f32.mrf.mxu2 }
 0x1f6   :  { %v602_v45 = vmax.f32 %v557_v42, 0.0  ;;  %v717_v46 = vadd.f32 %v1576_v56, %v716_v43 }
 0x1f8   :  { %v789_v47 = vsub.f32 0.0, %v717_v46  ;;  %v622_v48 = vpack.c.bf16 %v602_v45, %v601_v44  ;;  %v771_v45 = vpop.f32.mrf.mxu3 }
 0x1fa   :  { %v1232_v49 = vpop.eup %1231  ;;  %v826_v50 = vmul.f32 1.442695, %v789_v47  ;;  %758 = vmatmul.bf16.gmra.mxu2 %v622_v48  ;;  %v770_v48 = vadd.f32 %v1576_v56, %v769_v34 }
 0x1fb   :  { %v1234_v51 = vpop.eup %1233  ;;  %v884_v52 = vadd.f32 1.0, %v1232_v49  ;;  %v772_v49 = vadd.f32 %v1576_v56, %v771_v45 }
 0x1fc   :  { %948 = vst.msk [vmem:[%s1751_s7 + $0x18] sm:$0xff] %vm944_vm0, %v1234_v51  ;;  %1235 = vpow2.f32 %v826_v50  ;;  %v810_v51 = vsub.f32 0.0, %v770_v48 }
 0x1fd   :  { %1237 = vrcp.f32 %v884_v52  ;;  %v719_v6 = vpop.f32.mrf.mxu2  ;;  %v811_v52 = vsub.f32 0.0, %v772_v49 }
 0x1fe   :  { %v720_v53 = vadd.f32 %v1576_v56, %v719_v6 }
 0x200   :  { %v790_v54 = vsub.f32 0.0, %v720_v53 }
 0x202   :  { %v1236_v55 = vpop.eup %1235  ;;  %v828_v57 = vmul.f32 1.442695, %v790_v54  ;;  %v868_v54 = vmul.f32 1.442695, %v810_v51 }
 0x203   :  { %v1238_v30 = vpop.eup %1237  ;;  %v885_v58 = vadd.f32 1.0, %v1236_v55 }
 0x204   :  { %949 = vst.msk [vmem:[%s1751_s7 + $0x20] sm:$0xff] %vm944_vm0, %v1238_v30  ;;  %1239 = vpow2.f32 %v828_v57  ;;  %v870_v30 = vmul.f32 1.442695, %v811_v52 }
 0x205   :  { %1241 = vrcp.f32 %v885_v58  ;;  %v721_v59 = vpop.f32.mrf.mxu2 }
 0x206   :  { %v722_v60 = vadd.f32 %v1576_v56, %v721_v59 }
 0x208   :  { %v791_v61 = vsub.f32 0.0, %v722_v60  ;;  %v774_v60 = vpop.f32.mrf.mxu3 }
 0x20a   :  { %v1240_v62 = vpop.eup %1239  ;;  %v830_v63 = vmul.f32 1.442695, %v791_v61 }
 0x20b   :  { %v1242_v0 = vpop.eup %1241  ;;  %v886_v1 = vadd.f32 1.0, %v1240_v62 }
 0x20c   :  { %950 = vst.msk [vmem:[%s1751_s7 + $0x28] sm:$0xff] %vm944_vm0, %v1242_v0  ;;  %1243 = vpow2.f32 %v830_v63 }
 0x20d   :  { %1245 = vrcp.f32 %v886_v1  ;;  %v724_v2 = vpop.f32.mrf.mxu2 }
 0x20e   :  { %v725_v3 = vadd.f32 %v1576_v56, %v724_v2 }
 0x210   :  { %v792_v4 = vsub.f32 0.0, %v725_v3 }
 0x212   :  { %v1244_v5 = vpop.eup %1243  ;;  %v832_v7 = vmul.f32 1.442695, %v792_v4 }
 0x213   :  { %v1246_v8 = vpop.eup %1245  ;;  %v887_v9 = vadd.f32 1.0, %v1244_v5 }
 0x214   :  { %951 = vst.msk [vmem:[%s1751_s7 + $0x30] sm:$0xff] %vm944_vm0, %v1246_v8  ;;  %1247 = vpow2.f32 %v832_v7 }
 0x215   :  { %1249 = vrcp.f32 %v887_v9  ;;  %v726_v10 = vpop.f32.mrf.mxu2  ;;  %v776_v9 = vpop.f32.mrf.mxu3 }
 0x216   :  { %v727_v12 = vadd.f32 %v1576_v56, %v726_v10 }
 0x218   :  { %v793_v13 = vsub.f32 0.0, %v727_v12  ;;  %v775_v12 = vadd.f32 %v1576_v56, %v774_v60 }
 0x21a   :  { %v1248_v14 = vpop.eup %1247  ;;  %v834_v15 = vmul.f32 1.442695, %v793_v13  ;;  %v777_v13 = vadd.f32 %v1576_v56, %v776_v9 }
 0x21b   :  { %v1250_v16 = vpop.eup %1249  ;;  %v888_v17 = vadd.f32 1.0, %v1248_v14 }
 0x21c   :  { %952 = vst.msk [vmem:[%s1751_s7 + $0x38] sm:$0xff] %vm944_vm0, %v1250_v16  ;;  %1251 = vpow2.f32 %v834_v15  ;;  %v812_v15 = vsub.f32 0.0, %v775_v12  ;;  %v813_v16 = vsub.f32 0.0, %v777_v13 }
 0x21d   :  { %1253 = vrcp.f32 %v888_v17  ;;  %v729_v18 = vpop.f32.mrf.mxu2  ;;  %v779_v25 = vpop.f32.mrf.mxu3 }
 0x21e   :  { %v730_v20 = vadd.f32 %v1576_v56, %v729_v18  ;;  %v872_v19 = vmul.f32 1.442695, %v812_v15  ;;  %v874_v22 = vmul.f32 1.442695, %v813_v16 }
 0x220   :  { %v794_v23 = vsub.f32 0.0, %v730_v20 }
 0x222   :  { %v1252_v26 = vpop.eup %1251  ;;  %v836_v27 = vmul.f32 1.442695, %v794_v23 }
 0x223   :  { %v1254_v29 = vpop.eup %1253  ;;  %v889_v31 = vadd.f32 1.0, %v1252_v26 }
 0x224   :  { %953 = vst.msk [vmem:[%s1751_s7 + $0x40] sm:$0xff] %vm944_vm0, %v1254_v29  ;;  %1255 = vpow2.f32 %v836_v27 }
 0x225   :  { %1257 = vrcp.f32 %v889_v31  ;;  %v731_v33 = vpop.f32.mrf.mxu2 }
 0x226   :  { %v732_v35 = vadd.f32 %v1576_v56, %v731_v33  ;;  %1259 = vpow2.f32 %v864_v28 }
 0x227   :  { %1261 = vpow2.f32 %v866_v32 }
 0x228   :  { %v795_v36 = vsub.f32 0.0, %v732_v35 }
 0x22a   :  { %v1256_v37 = vpop.eup %1255  ;;  %v838_v38 = vmul.f32 1.442695, %v795_v36 }
 0x22b   :  { %v1258_v39 = vpop.eup %1257  ;;  %v890_v40 = vadd.f32 1.0, %v1256_v37 }
 0x22c   :  { %v1260_v41 = vpop.eup %1259  ;;  %954 = vst.msk [vmem:[%s1751_s7 + $0x48] sm:$0xff] %vm944_vm0, %v1258_v39  ;;  %1263 = vpow2.f32 %v838_v38  ;;  %v781_v38 = vpop.f32.mrf.mxu3 }
 0x22d   :  { %v1262_v42 = vpop.eup %1261  ;;  %1265 = vrcp.f32 %v890_v40  ;;  %v734_v43 = vpop.f32.mrf.mxu2  ;;  %v904_v44 = vadd.f32 1.0, %v1260_v41  ;;  %v780_v41 = vadd.f32 %v1576_v56, %v779_v25 }
 0x22e   :  { %v735_v46 = vadd.f32 %v1576_v56, %v734_v43  ;;  %v905_v47 = vadd.f32 1.0, %v1262_v42  ;;  %v782_v42 = vadd.f32 %v1576_v56, %v781_v38 }
 0x22f   :  { %1267 = vrcp.f32 %v904_v44  ;;  %v814_v44 = vsub.f32 0.0, %v780_v41 }
 0x230   :  { %v796_v50 = vsub.f32 0.0, %v735_v46  ;;  %1269 = vrcp.f32 %v905_v47  ;;  %v815_v45 = vsub.f32 0.0, %v782_v42 }
 0x231   :  { %v876_v48 = vmul.f32 1.442695, %v814_v44 }
 0x232   :  { %v1264_v6 = vpop.eup %1263  ;;  %v840_v53 = vmul.f32 1.442695, %v796_v50  ;;  %v878_v51 = vmul.f32 1.442695, %v815_v45 }
 0x233   :  { %v1266_v55 = vpop.eup %1265  ;;  %v891_v57 = vadd.f32 1.0, %v1264_v6 }
 0x234   :  { %955 = vst.msk [vmem:[%s1751_s7 + $0x50] sm:$0xff] %vm944_vm0, %v1266_v55  ;;  %1271 = vpow2.f32 %v840_v53 }
 0x235   :  { %v1268_v58 = vpop.eup %1267  ;;  %1273 = vrcp.f32 %v891_v57  ;;  %v736_v59 = vpop.f32.mrf.mxu2 }
 0x236   :  { %v1270_v61 = vpop.eup %1269  ;;  %v737_v62 = vadd.f32 %v1576_v56, %v736_v59  ;;  %969 = vst.msk [vmem:[%s1751_s7 + $0xc0] sm:$0xff] %vm944_vm0, %v1268_v58  ;;  %1275 = vpow2.f32 %v868_v54 }
 0x237   :  { %970 = vst.msk [vmem:[%s1751_s7 + $0xc8] sm:$0xff] %vm944_vm0, %v1270_v61  ;;  %1277 = vpow2.f32 %v870_v30 }
 0x238   :  { %v797_v63 = vsub.f32 0.0, %v737_v62 }
 0x23a   :  { %v1272_v0 = vpop.eup %1271  ;;  %v842_v1 = vmul.f32 1.442695, %v797_v63 }
 0x23b   :  { %v1274_v2 = vpop.eup %1273  ;;  %v892_v3 = vadd.f32 1.0, %v1272_v0 }
 0x23c   :  { %v1276_v4 = vpop.eup %1275  ;;  %956 = vst.msk [vmem:[%s1751_s7 + $0x58] sm:$0xff] %vm944_vm0, %v1274_v2  ;;  %1279 = vpow2.f32 %v842_v1 }
 0x23d   :  { %v1278_v5 = vpop.eup %1277  ;;  %1281 = vrcp.f32 %v892_v3  ;;  %v739_v7 = vpop.f32.mrf.mxu2  ;;  %v906_v8 = vadd.f32 1.0, %v1276_v4 }
 0x23e   :  { %v740_v10 = vadd.f32 %v1576_v56, %v739_v7  ;;  %v907_v11 = vadd.f32 1.0, %v1278_v5 }
 0x23f   :  { %1283 = vrcp.f32 %v906_v8 }
 0x240   :  { %v798_v14 = vsub.f32 0.0, %v740_v10  ;;  %1285 = vrcp.f32 %v907_v11 }
 0x242   :  { %v1280_v17 = vpop.eup %1279  ;;  %v844_v18 = vmul.f32 1.442695, %v798_v14 }
 0x243   :  { %v1282_v20 = vpop.eup %1281  ;;  %v893_v21 = vadd.f32 1.0, %v1280_v17 }
 0x244   :  { %957 = vst.msk [vmem:[%s1751_s7 + $0x60] sm:$0xff] %vm944_vm0, %v1282_v20  ;;  %1287 = vpow2.f32 %v844_v18 }
 0x245   :  { %v1284_v23 = vpop.eup %1283  ;;  %1289 = vrcp.f32 %v893_v21  ;;  %v741_v24 = vpop.f32.mrf.mxu2 }
 0x246   :  { %v1286_v26 = vpop.eup %1285  ;;  %v742_v27 = vadd.f32 %v1576_v56, %v741_v24  ;;  %971 = vst.msk [vmem:[%s1751_s7 + $0xd0] sm:$0xff] %vm944_vm0, %v1284_v23  ;;  %1291 = vpow2.f32 %v872_v19 }
 0x247   :  { %972 = vst.msk [vmem:[%s1751_s7 + $0xd8] sm:$0xff] %vm944_vm0, %v1286_v26  ;;  %1293 = vpow2.f32 %v874_v22 }
 0x248   :  { %v799_v28 = vsub.f32 0.0, %v742_v27 }
 0x24a   :  { %v1288_v29 = vpop.eup %1287  ;;  %v846_v31 = vmul.f32 1.442695, %v799_v28 }
 0x24b   :  { %v1290_v32 = vpop.eup %1289  ;;  %v894_v33 = vadd.f32 1.0, %v1288_v29 }
 0x24c   :  { %v1292_v34 = vpop.eup %1291  ;;  %958 = vst.msk [vmem:[%s1751_s7 + $0x68] sm:$0xff] %vm944_vm0, %v1290_v32  ;;  %1295 = vpow2.f32 %v846_v31 }
 0x24d   :  { %v1294_v35 = vpop.eup %1293  ;;  %1297 = vrcp.f32 %v894_v33  ;;  %v744_v36 = vpop.f32.mrf.mxu2  ;;  %v908_v37 = vadd.f32 1.0, %v1292_v34 }
 0x24e   :  { %v745_v39 = vadd.f32 %v1576_v56, %v744_v36  ;;  %v909_v40 = vadd.f32 1.0, %v1294_v35 }
 0x24f   :  { %1299 = vrcp.f32 %v908_v37 }
 0x250   :  { %v800_v43 = vsub.f32 0.0, %v745_v39  ;;  %1301 = vrcp.f32 %v909_v40 }
 0x252   :  { %v1296_v46 = vpop.eup %1295  ;;  %v848_v47 = vmul.f32 1.442695, %v800_v43 }
 0x253   :  { %v1298_v49 = vpop.eup %1297  ;;  %v895_v50 = vadd.f32 1.0, %v1296_v46 }
 0x254   :  { %959 = vst.msk [vmem:[%s1751_s7 + $0x70] sm:$0xff] %vm944_vm0, %v1298_v49  ;;  %1303 = vpow2.f32 %v848_v47 }
 0x255   :  { %v1300_v52 = vpop.eup %1299  ;;  %1305 = vrcp.f32 %v895_v50  ;;  %v746_v6 = vpop.f32.mrf.mxu2 }
 0x256   :  { %v1302_v53 = vpop.eup %1301  ;;  %v747_v54 = vadd.f32 %v1576_v56, %v746_v6  ;;  %973 = vst.msk [vmem:[%s1751_s7 + $0xe0] sm:$0xff] %vm944_vm0, %v1300_v52  ;;  %1307 = vpow2.f32 %v876_v48 }
 0x257   :  { %974 = vst.msk [vmem:[%s1751_s7 + $0xe8] sm:$0xff] %vm944_vm0, %v1302_v53  ;;  %1309 = vpow2.f32 %v878_v51 }
 0x258   :  { %v801_v55 = vsub.f32 0.0, %v747_v54 }
 0x25a   :  { %v1304_v57 = vpop.eup %1303  ;;  %v850_v30 = vmul.f32 1.442695, %v801_v55 }
 0x25b   :  { %v1306_v58 = vpop.eup %1305  ;;  %v896_v59 = vadd.f32 1.0, %v1304_v57 }
 0x25c   :  { %v1308_v60 = vpop.eup %1307  ;;  %960 = vst.msk [vmem:[%s1751_s7 + $0x78] sm:$0xff] %vm944_vm0, %v1306_v58  ;;  %1311 = vpow2.f32 %v850_v30 }
 0x25d   :  { %v1310_v61 = vpop.eup %1309  ;;  %1313 = vrcp.f32 %v896_v59  ;;  %v749_v62 = vpop.f32.mrf.mxu2  ;;  %v910_v63 = vadd.f32 1.0, %v1308_v60 }
 0x25e   :  { %v750_v0 = vadd.f32 %v1576_v56, %v749_v62  ;;  %v911_v1 = vadd.f32 1.0, %v1310_v61 }
 0x25f   :  { %1315 = vrcp.f32 %v910_v63 }
 0x260   :  { %v802_v2 = vsub.f32 0.0, %v750_v0  ;;  %1317 = vrcp.f32 %v911_v1 }
 0x262   :  { %v1312_v3 = vpop.eup %1311  ;;  %v852_v4 = vmul.f32 1.442695, %v802_v2 }
 0x263   :  { %v1314_v5 = vpop.eup %1313  ;;  %v897_v7 = vadd.f32 1.0, %v1312_v3 }
 0x264   :  { %961 = vst.msk [vmem:[%s1751_s7 + $0x80] sm:$0xff] %vm944_vm0, %v1314_v5  ;;  %1319 = vpow2.f32 %v852_v4 }
 0x265   :  { %v1316_v8 = vpop.eup %1315  ;;  %1321 = vrcp.f32 %v897_v7  ;;  %v751_v9 = vpop.f32.mrf.mxu2 }
 0x266   :  { %v1318_v10 = vpop.eup %1317  ;;  %v752_v11 = vadd.f32 %v1576_v56, %v751_v9  ;;  %975 = vst.msk [vmem:[%s1751_s7 + $0xf0] sm:$0xff] %vm944_vm0, %v1316_v8 }
 0x267   :  { %976 = vst.msk [vmem:[%s1751_s7 + $0xf8] sm:$0xff] %vm944_vm0, %v1318_v10 }
 0x268   :  { %v803_v12 = vsub.f32 0.0, %v752_v11 }
 0x26a   :  { %v1320_v13 = vpop.eup %1319  ;;  %v854_v14 = vmul.f32 1.442695, %v803_v12 }
 0x26b   :  { %v1322_v15 = vpop.eup %1321  ;;  %v898_v16 = vadd.f32 1.0, %v1320_v13 }
 0x26c   :  { %962 = vst.msk [vmem:[%s1751_s7 + $0x88] sm:$0xff] %vm944_vm0, %v1322_v15  ;;  %1323 = vpow2.f32 %v854_v14 }
 0x26d   :  { %1325 = vrcp.f32 %v898_v16  ;;  %v754_v17 = vpop.f32.mrf.mxu2 }
 0x26e   :  { %v755_v18 = vadd.f32 %v1576_v56, %v754_v17 }
 0x270   :  { %v804_v19 = vsub.f32 0.0, %v755_v18 }
 0x272   :  { %v1324_v20 = vpop.eup %1323  ;;  %v856_v21 = vmul.f32 1.442695, %v804_v19 }
 0x273   :  { %v1326_v22 = vpop.eup %1325  ;;  %v899_v23 = vadd.f32 1.0, %v1324_v20 }
 0x274   :  { %963 = vst.msk [vmem:[%s1751_s7 + $0x90] sm:$0xff] %vm944_vm0, %v1326_v22  ;;  %1327 = vpow2.f32 %v856_v21 }
 0x275   :  { %1329 = vrcp.f32 %v899_v23  ;;  %v756_v24 = vpop.f32.mrf.mxu2 }
 0x276   :  { %v757_v25 = vadd.f32 %v1576_v56, %v756_v24 }
 0x278   :  { %v805_v26 = vsub.f32 0.0, %v757_v25 }
 0x27a   :  { %v1328_v27 = vpop.eup %1327  ;;  %v858_v28 = vmul.f32 1.442695, %v805_v26 }
 0x27b   :  { %v1330_v29 = vpop.eup %1329  ;;  %v900_v31 = vadd.f32 1.0, %v1328_v27 }
 0x27c   :  { %964 = vst.msk [vmem:[%s1751_s7 + $0x98] sm:$0xff] %vm944_vm0, %v1330_v29  ;;  %1331 = vpow2.f32 %v858_v28 }
 0x27d   :  { %1333 = vrcp.f32 %v900_v31  ;;  %v759_v32 = vpop.f32.mrf.mxu2 }
 0x27e   :  { %v760_v33 = vadd.f32 %v1576_v56, %v759_v32 }
 0x280   :  { %v806_v34 = vsub.f32 0.0, %v760_v33 }
 0x282   :  { %v1332_v35 = vpop.eup %1331  ;;  %v860_v36 = vmul.f32 1.442695, %v806_v34 }
 0x283   :  { %v1334_v37 = vpop.eup %1333  ;;  %v901_v38 = vadd.f32 1.0, %v1332_v35 }
 0x284   :  { %965 = vst.msk [vmem:[%s1751_s7 + $0xa0] sm:$0xff] %vm944_vm0, %v1334_v37  ;;  %1335 = vpow2.f32 %v860_v36 }
 0x285   :  { %1337 = vrcp.f32 %v901_v38  ;;  %v761_v39 = vpop.f32.mrf.mxu2 }
 0x286   :  { %v762_v40 = vadd.f32 %v1576_v56, %v761_v39 }
 0x288   :  { %v807_v41 = vsub.f32 0.0, %v762_v40 }
 0x28a   :  { %v1336_v42 = vpop.eup %1335  ;;  %v862_v43 = vmul.f32 1.442695, %v807_v41 }
 0x28b   :  { %v1338_v44 = vpop.eup %1337  ;;  %v902_v45 = vadd.f32 1.0, %v1336_v42 }
 0x28c   :  { %966 = vst.msk [vmem:[%s1751_s7 + $0xa8] sm:$0xff] %vm944_vm0, %v1338_v44  ;;  %1339 = vpow2.f32 %v862_v43 }
 0x28d   :  { %1341 = vrcp.f32 %v902_v45 }
 0x292   :  { %v1340_v46 = vpop.eup %1339 }
 0x293   :  { %v1342_v47 = vpop.eup %1341  ;;  %v903_v48 = vadd.f32 1.0, %v1340_v46 }
 0x294   :  { %967 = vst.msk [vmem:[%s1751_s7 + $0xb0] sm:$0xff] %vm944_vm0, %v1342_v47 }
 0x295   :  { %1343 = vrcp.f32 %v903_v48 }
 0x29b   :  { %v1344_v56 = vpop.eup %1343 }
 0x29c   :  { %968 = vst.msk [vmem:[%s1751_s7 + $0xb8] sm:$0xff] %vm944_vm0, %v1344_v56 }
 0x29d   :  { %981 = vsyncpa [#allocation3], 1 }
 0x29e   :  { %982 = vsyncpa [#allocation5], 1 }
 0x29f   :  { %983 = vsyncpa [#allocation8], 1 }

// kernel: tpu_custom_call.1
= control target key start
LH: loop header
LB: loop body
LE: loop exit
PB: predicated region body
PF: predicated region fallthrough
CT: control target
= control target key end

     0   :  { %12 = vsyncpa [#allocation3], 0  ;;  %s1744_s0 = inlined_call_operand.hbm [shape: bf16[256,128], index: 0, kind: input, shape index: {}]   ;;  %s1745_s1 = inlined_call_operand.hbm [shape: bf16[128,128], index: 1, kind: input, shape index: {}]   ;;  %s1746_s2 = inlined_call_operand.vmem [shape: f32[1,128], index: 2, kind: input, shape index: {}]   ;;  %s1747_s3 = inlined_call_operand.hbm [shape: bf16[128,128], index: 3, kind: input, shape index: {}]   ;;  %s1748_s4 = inlined_call_operand.vmem [shape: f32[1,128], index: 4, kind: input, shape index: {}]   ;;  %s1749_s5 = inlined_call_operand.hbm [shape: bf16[128,128], index: 5, kind: input, shape index: {}]   ;;  %s1750_s6 = inlined_call_operand.vmem [shape: f32[1,128], index: 6, kind: input, shape index: {}]   ;;  %s1751_s7 = inlined_call_operand.vmem [shape: f32[256,1], index: 7, kind: output, shape index: {}]  }
   0x1   :  { %13 = vsyncpa [#allocation5], 0 }
   0x2   :  { %14 = vsyncpa [#allocation8], 0  ;;  %s32_s26 = sshll.u32 %s1745_s1, 4  ;;  %s1447_s27 = smov [#allocation4]   ;;  %s33_s26 = int_to_ptr.hbm [resolvable:$true] %s32_s26 }
   0x3   :  { %s34_s28 = sshll.u32 %s1447_s27, 4  ;;  %s19_s8 = sshll.u32 %s1744_s0, 4  ;;  %s35_s28 = int_to_ptr.vmem [resolvable:$true] %s34_s28  ;;  %s20_s8 = int_to_ptr.hbm [resolvable:$true] %s19_s8 }
   0x4   :  { %s1448_s9 = smov 64   ;;  %s1449_s10 = smov 4  }
   0x5   :  { %40 = dma.hbm_to_vmem [thread:$0]  %s33_s26, 1024, %s35_s28, [#allocation5], %s1448_s9, %s1448_s9, %s1449_s10  }
   0x6   :  { %s1450_s11 = smov [#allocation2]   ;;  %s47_s15 = sshll.u32 %s1747_s3, 4  ;;  %s48_s15 = int_to_ptr.hbm [resolvable:$true] %s47_s15 }
   0x7   :  { %s21_s12 = sshll.u32 %s1450_s11, 4  ;;  %s62_s17 = sshll.u32 %s1749_s5, 4  ;;  %s22_s12 = int_to_ptr.vmem [resolvable:$true] %s21_s12  ;;  %s63_s17 = int_to_ptr.hbm [resolvable:$true] %s62_s17 }
   0x8   :  { %27 = dma.hbm_to_vmem [thread:$0]  %s20_s8, 2048, %s22_s12, [#allocation3], %s1448_s9, %s1448_s9, %s1449_s10  }
   0x9   :  { %s1451_s18 = smov [#allocation6]   ;;  %s1452_s0 = smov [#allocation7]  }
   0xa   :  { %s49_s19 = sshll.u32 %s1451_s18, 4  ;;  %s64_s20 = sshll.u32 %s1452_s0, 4  ;;  %s50_s19 = int_to_ptr.vmem [resolvable:$true] %s49_s19  ;;  %s65_s20 = int_to_ptr.vmem [resolvable:$true] %s64_s20 }
   0xb   :  { %55 = dma.hbm_to_vmem [thread:$0]  %s48_s15, 1024, %s50_s19, [#allocation5], %s1448_s9, %s1448_s9, %s1449_s10  }
   0xc   :  { %70 = dma.hbm_to_vmem [thread:$0]  %s63_s17, 1024, %s65_s20, [#allocation8], %s1448_s9, %s1448_s9, %s1449_s10  }
   0xd   :  { %1441 = dma.done.wait [#allocation3], 2048  }
   0xe   :  { %1442 = vsyncadd [#allocation3], 4294965248 }
   0xf   :  { %1443 = dma.done.wait [#allocation5], 2048  }
  0x10   :  { %1444 = vsyncadd [#allocation5], 4294965248 }
  0x11   :  { %1445 = dma.done.wait [#allocation8], 1024  }
  0x12   :  { %1446 = vsyncadd [#allocation8], 4294966272  ;;  %v1167_v0 = vld [vmem:[#allocation4 + $0x38] sm:$0xff]  ;;  %v1166_v1 = vld [vmem:[#allocation4 + $0x30] sm:$0xff]  ;;  %vm944_vm0 = vcmask 7168  }
  0x13   :  { %285 = vmatpush.bf16.msra.mxu0 %v1167_v0  ;;  %1184 = vmatpush.bf16.msra.mxu3 %v1167_v0  ;;  %v1165_v2 = vld [vmem:[#allocation4 + $0x28] sm:$0xff]  ;;  %v1164_v3 = vld [vmem:[#allocation4 + $0x20] sm:$0xff]  ;;  %v1163_v4 = vld [vmem:[#allocation4 + $0x18] sm:$0xff] }
  0x14   :  { %v1162_v5 = vld [vmem:[#allocation4 + $0x10] sm:$0xff]  ;;  %v1161_v6 = vld [vmem:[#allocation4 + $0x8] sm:$0xff]  ;;  %v1160_v7 = vld [vmem:[#allocation4] sm:$0xff] }
  0x15   :  { %v1144_v8 = vld [vmem:[#allocation2] sm:$0xff]  ;;  %v1145_v9 = vld [vmem:[#allocation2 + $0x8] sm:$0xff]  ;;  %v1146_v10 = vld [vmem:[#allocation2 + $0x10] sm:$0xff] }
  0x16   :  { %v1147_v11 = vld [vmem:[#allocation2 + $0x18] sm:$0xff]  ;;  %v1156_v12 = vld [vmem:[#allocation2 + $0x60] sm:$0xff]  ;;  %v1157_v14 = vld [vmem:[#allocation2 + $0x68] sm:$0xff] }
  0x17   :  { %286 = vmatpush.bf16.msra.mxu0 %v1166_v1  ;;  %1185 = vmatpush.bf16.msra.mxu3 %v1166_v1  ;;  %v1148_v13 = vld [vmem:[#allocation2 + $0x20] sm:$0xff]  ;;  %v1175_v15 = vld [vmem:[#allocation6 + $0x38] sm:$0xff]  ;;  %v1149_v16 = vld [vmem:[#allocation2 + $0x28] sm:$0xff] }
  0x18   :  { %490 = vmatpush.bf16.msra.mxu1 %v1175_v15  ;;  %v1174_v17 = vld [vmem:[#allocation6 + $0x30] sm:$0xff]  ;;  %v1173_v19 = vld [vmem:[#allocation6 + $0x28] sm:$0xff]  ;;  %v1172_v20 = vld [vmem:[#allocation6 + $0x20] sm:$0xff] }
  0x19   :  { %v1158_v18 = vld [vmem:[#allocation2 + $0x70] sm:$0xff]  ;;  %v1171_v21 = vld [vmem:[#allocation6 + $0x18] sm:$0xff]  ;;  %v1169_v24 = vld [vmem:[#allocation6 + $0x8] sm:$0xff] }
  0x1a   :  { %v1150_v22 = vld [vmem:[#allocation2 + $0x30] sm:$0xff]  ;;  %v1168_v25 = vld [vmem:[#allocation6] sm:$0xff]  ;;  %v1159_v26 = vld [vmem:[#allocation2 + $0x78] sm:$0xff] }
  0x1b   :  { %287 = vmatpush.bf16.msra.mxu0 %v1165_v2  ;;  %1186 = vmatpush.bf16.msra.mxu3 %v1165_v2  ;;  %v1170_v23 = vld [vmem:[#allocation6 + $0x10] sm:$0xff]  ;;  %v1151_v27 = vld [vmem:[#allocation2 + $0x38] sm:$0xff]  ;;  %v1152_v28 = vld [vmem:[#allocation2 + $0x40] sm:$0xff] }
  0x1c   :  { %491 = vmatpush.bf16.msra.mxu1 %v1174_v17  ;;  %v1508_v30 = vld [vmem:[%s1746_s2] ss:$0 sm:$0xff]  ;;  %v1153_v37 = vld [vmem:[#allocation2 + $0x48] sm:$0xff]  ;;  %v1154_v45 = vld [vmem:[#allocation2 + $0x50] sm:$0xff] }
  0x1d   :  { %v1155_v53 = vld [vmem:[#allocation2 + $0x58] sm:$0xff] }
  0x1f   :  { %288 = vmatpush.bf16.msra.mxu0 %v1164_v3  ;;  %1187 = vmatpush.bf16.msra.mxu3 %v1164_v3 }
  0x20   :  { %492 = vmatpush.bf16.msra.mxu1 %v1173_v19 }
  0x23   :  { %289 = vmatpush.bf16.msra.mxu0 %v1163_v4  ;;  %1188 = vmatpush.bf16.msra.mxu3 %v1163_v4 }
  0x24   :  { %493 = vmatpush.bf16.msra.mxu1 %v1172_v20 }
  0x27   :  { %290 = vmatpush.bf16.msra.mxu0 %v1162_v5  ;;  %1189 = vmatpush.bf16.msra.mxu3 %v1162_v5 }
  0x28   :  { %494 = vmatpush.bf16.msra.mxu1 %v1171_v21 }
  0x2b   :  { %291 = vmatpush.bf16.msra.mxu0 %v1161_v6  ;;  %1190 = vmatpush.bf16.msra.mxu3 %v1161_v6 }
  0x2c   :  { %495 = vmatpush.bf16.msra.mxu1 %v1170_v23 }
  0x2f   :  { %292 = vmatpush.bf16.msra.mxu0 %v1160_v7  ;;  %1191 = vmatpush.bf16.msra.mxu3 %v1160_v7 }
  0x30   :  { %496 = vmatpush.bf16.msra.mxu1 %v1169_v24 }
  0x32   :  { %293 = vmatmul.bf16.vlgmr.msra.gmra.mxu0 %v1144_v8  ;;  %353 = vmatmul.bf16.vlgmr.msra.gmra.mxu3 %v1156_v12 }
  0x33   :  { %1192 = vmatpush.bf16.msrb.mxu3 %v1175_v15 }
  0x34   :  { %497 = vmatpush.bf16.msra.mxu1 %v1168_v25 }
  0x37   :  { %1193 = vmatpush.bf16.msrb.mxu3 %v1174_v17 }
  0x3b   :  { %1194 = vmatpush.bf16.msrb.mxu3 %v1173_v19 }
  0x3f   :  { %1195 = vmatpush.bf16.msrb.mxu3 %v1172_v20 }
  0x42   :  { %298 = vmatmul.bf16.gmra.mxu0 %v1145_v9  ;;  %358 = vmatmul.bf16.gmra.mxu3 %v1157_v14 }
  0x43   :  { %1196 = vmatpush.bf16.msrb.mxu3 %v1171_v21 }
  0x47   :  { %1197 = vmatpush.bf16.msrb.mxu3 %v1170_v23 }
  0x4b   :  { %1198 = vmatpush.bf16.msrb.mxu3 %v1169_v24 }
  0x4f   :  { %1199 = vmatpush.bf16.msrb.mxu3 %v1168_v25  ;;  %v1182_v25 = vld [vmem:[#allocation7 + $0x30] sm:$0xff] }
  0x52   :  { %303 = vmatmul.bf16.gmra.mxu0 %v1146_v10  ;;  %363 = vmatmul.bf16.gmra.mxu3 %v1158_v18  ;;  %v1183_v18 = vld [vmem:[#allocation7 + $0x38] sm:$0xff] }
  0x53   :  { %695 = vmatpush.bf16.msra.mxu2 %v1183_v18  ;;  %1200 = vmatpush.bf16.msra.mxu3 %v1183_v18 }
  0x57   :  { %696 = vmatpush.bf16.msra.mxu2 %v1182_v25  ;;  %1201 = vmatpush.bf16.msra.mxu3 %v1182_v25 }
  0x62   :  { %308 = vmatmul.bf16.gmra.mxu0 %v1147_v11  ;;  %368 = vmatmul.bf16.gmra.mxu3 %v1159_v26 }
  0x72   :  { %313 = vmatmul.bf16.gmra.mxu0 %v1148_v13 }
  0x82   :  { %318 = vmatmul.bf16.gmra.mxu0 %v1149_v16 }
  0x92   :  { %323 = vmatmul.bf16.gmra.mxu0 %v1150_v22 }
  0xa2   :  { %328 = vmatmul.bf16.gmra.mxu0 %v1151_v27 }
  0xaf   :  { %v294_v29 = vpop.f32.mrf.mxu0 }
  0xb0   :  { %v295_v31 = vadd.f32 %v1508_v30, %v294_v29  ;;  %v1181_v29 = vld [vmem:[#allocation7 + $0x28] sm:$0xff] }
  0xb1   :  { %697 = vmatpush.bf16.msra.mxu2 %v1181_v29  ;;  %1202 = vmatpush.bf16.msra.mxu3 %v1181_v29 }
  0xb2   :  { %333 = vmatmul.bf16.gmra.mxu0 %v1152_v28  ;;  %v374_v34 = vmax.f32 %v295_v31, 0.0  ;;  %v1180_v31 = vld [vmem:[#allocation7 + $0x20] sm:$0xff] }
  0xb5   :  { %v354_v62 = vpop.f32.mrf.mxu3  ;;  %698 = vmatpush.bf16.msra.mxu2 %v1180_v31  ;;  %1203 = vmatpush.bf16.msra.mxu3 %v1180_v31 }
  0xb6   :  { %v355_v0 = vadd.f32 %v1508_v30, %v354_v62 }
  0xb7   :  { %v296_v32 = vpop.f32.mrf.mxu0 }
  0xb8   :  { %v297_v33 = vadd.f32 %v1508_v30, %v296_v32  ;;  %v398_v6 = vmax.f32 %v355_v0, 0.0 }
  0xba   :  { %v375_v35 = vmax.f32 %v297_v33, 0.0 }
  0xbc   :  { %v406_v36 = vpack.c.bf16 %v375_v35, %v374_v34 }
  0xbd   :  { %v356_v3 = vpop.f32.mrf.mxu3 }
  0xbe   :  { %498 = vmatmul.bf16.vlgmr.msra.gmra.mxu1 %v406_v36  ;;  %v357_v7 = vadd.f32 %v1508_v30, %v356_v3 }
  0xbf   :  { %v299_v38 = vpop.f32.mrf.mxu0 }
  0xc0   :  { %v300_v39 = vadd.f32 %v1508_v30, %v299_v38  ;;  %v399_v9 = vmax.f32 %v357_v7, 0.0 }
  0xc2   :  { %338 = vmatmul.bf16.gmra.mxu0 %v1153_v37  ;;  %v376_v42 = vmax.f32 %v300_v39, 0.0  ;;  %v418_v10 = vpack.c.bf16 %v399_v9, %v398_v6  ;;  %v1179_v37 = vld [vmem:[#allocation7 + $0x18] sm:$0xff]  ;;  %v1539_v6 = vld [vmem:[%s1748_s4] ss:$0 sm:$0xff] }
  0xc3   :  { %699 = vmatpush.bf16.msra.mxu2 %v1179_v37  ;;  %1204 = vmatpush.bf16.msra.mxu3 %v1179_v37 }
  0xc4   :  { %558 = vmatmul.bf16.vlgmr.msrb.gmra.mxu3 %v418_v10 }
  0xc5   :  { %v359_v12 = vpop.f32.mrf.mxu3 }
  0xc6   :  { %v360_v14 = vadd.f32 %v1508_v30, %v359_v12 }
  0xc7   :  { %v301_v40 = vpop.f32.mrf.mxu0 }
  0xc8   :  { %v302_v41 = vadd.f32 %v1508_v30, %v301_v40  ;;  %v400_v21 = vmax.f32 %v360_v14, 0.0 }
  0xca   :  { %v377_v43 = vmax.f32 %v302_v41, 0.0 }
  0xcc   :  { %v407_v44 = vpack.c.bf16 %v377_v43, %v376_v42 }
  0xcd   :  { %v361_v17 = vpop.f32.mrf.mxu3 }
  0xce   :  { %503 = vmatmul.bf16.gmra.mxu1 %v407_v44  ;;  %v362_v22 = vadd.f32 %v1508_v30, %v361_v17  ;;  %v1178_v44 = vld [vmem:[#allocation7 + $0x10] sm:$0xff] }
  0xcf   :  { %v304_v46 = vpop.f32.mrf.mxu0  ;;  %700 = vmatpush.bf16.msra.mxu2 %v1178_v44  ;;  %1205 = vmatpush.bf16.msra.mxu3 %v1178_v44 }
  0xd0   :  { %v305_v47 = vadd.f32 %v1508_v30, %v304_v46  ;;  %v401_v24 = vmax.f32 %v362_v22, 0.0 }
  0xd2   :  { %343 = vmatmul.bf16.gmra.mxu0 %v1154_v45  ;;  %v378_v50 = vmax.f32 %v305_v47, 0.0  ;;  %v419_v26 = vpack.c.bf16 %v401_v24, %v400_v21 }
  0xd4   :  { %563 = vmatmul.bf16.gmra.mxu3 %v419_v26 }
  0xd5   :  { %v364_v28 = vpop.f32.mrf.mxu3 }
  0xd6   :  { %v365_v33 = vadd.f32 %v1508_v30, %v364_v28 }
  0xd7   :  { %v306_v48 = vpop.f32.mrf.mxu0 }
  0xd8   :  { %v307_v49 = vadd.f32 %v1508_v30, %v306_v48  ;;  %v402_v40 = vmax.f32 %v365_v33, 0.0  ;;  %v1177_v48 = vld [vmem:[#allocation7 + $0x8] sm:$0xff] }
  0xd9   :  { %701 = vmatpush.bf16.msra.mxu2 %v1177_v48  ;;  %1206 = vmatpush.bf16.msra.mxu3 %v1177_v48 }
  0xda   :  { %v379_v51 = vmax.f32 %v307_v49, 0.0  ;;  %v1176_v49 = vld [vmem:[#allocation7] sm:$0xff] }
  0xdc   :  { %v408_v52 = vpack.c.bf16 %v379_v51, %v378_v50 }
  0xdd   :  { %v366_v36 = vpop.f32.mrf.mxu3  ;;  %702 = vmatpush.bf16.msra.mxu2 %v1176_v49  ;;  %1207 = vmatpush.bf16.msra.mxu3 %v1176_v49 }
  0xde   :  { %508 = vmatmul.bf16.gmra.mxu1 %v408_v52  ;;  %v367_v41 = vadd.f32 %v1508_v30, %v366_v36 }
  0xdf   :  { %v309_v54 = vpop.f32.mrf.mxu0 }
  0xe0   :  { %v310_v55 = vadd.f32 %v1508_v30, %v309_v54  ;;  %v403_v43 = vmax.f32 %v367_v41, 0.0 }
  0xe2   :  { %348 = vmatmul.bf16.gmra.mxu0 %v1155_v53  ;;  %v380_v58 = vmax.f32 %v310_v55, 0.0  ;;  %v420_v45 = vpack.c.bf16 %v403_v43, %v402_v40 }
  0xe4   :  { %568 = vmatmul.bf16.gmra.mxu3 %v420_v45 }
  0xe5   :  { %v369_v47 = vpop.f32.mrf.mxu3 }
  0xe6   :  { %v370_v51 = vadd.f32 %v1508_v30, %v369_v47 }
  0xe7   :  { %v311_v56 = vpop.f32.mrf.mxu0 }
  0xe8   :  { %v312_v57 = vadd.f32 %v1508_v30, %v311_v56 }
  0xea   :  { %v381_v59 = vmax.f32 %v312_v57, 0.0  ;;  %v404_v57 = vmax.f32 %v370_v51, 0.0 }
  0xec   :  { %v409_v60 = vpack.c.bf16 %v381_v59, %v380_v58 }
  0xed   :  { %v371_v54 = vpop.f32.mrf.mxu3 }
  0xee   :  { %513 = vmatmul.bf16.gmra.mxu1 %v409_v60  ;;  %v372_v58 = vadd.f32 %v1508_v30, %v371_v54 }
  0xef   :  { %v314_v61 = vpop.f32.mrf.mxu0 }
  0xf0   :  { %v315_v63 = vadd.f32 %v1508_v30, %v314_v61  ;;  %v405_v60 = vmax.f32 %v372_v58, 0.0 }
  0xf2   :  { %v382_v4 = vmax.f32 %v315_v63, 0.0  ;;  %v421_v61 = vpack.c.bf16 %v405_v60, %v404_v57 }
  0xf4   :  { %573 = vmatmul.bf16.gmra.mxu3 %v421_v61 }
  0xf7   :  { %v316_v1 = vpop.f32.mrf.mxu0 }
  0xf8   :  { %v317_v2 = vadd.f32 %v1508_v30, %v316_v1 }
  0xfa   :  { %v383_v5 = vmax.f32 %v317_v2, 0.0 }
  0xfc   :  { %v410_v8 = vpack.c.bf16 %v383_v5, %v382_v4 }
  0xfe   :  { %518 = vmatmul.bf16.gmra.mxu1 %v410_v8 }
  0xff   :  { %v319_v11 = vpop.f32.mrf.mxu0 }
 0x100   :  { %v320_v13 = vadd.f32 %v1508_v30, %v319_v11 }
 0x102   :  { %v384_v19 = vmax.f32 %v320_v13, 0.0 }
 0x107   :  { %v321_v15 = vpop.f32.mrf.mxu0 }
 0x108   :  { %v322_v16 = vadd.f32 %v1508_v30, %v321_v15 }
 0x10a   :  { %v385_v20 = vmax.f32 %v322_v16, 0.0 }
 0x10c   :  { %v411_v23 = vpack.c.bf16 %v385_v20, %v384_v19 }
 0x10e   :  { %523 = vmatmul.bf16.gmra.mxu1 %v411_v23 }
 0x10f   :  { %v324_v27 = vpop.f32.mrf.mxu0 }
 0x110   :  { %v325_v32 = vadd.f32 %v1508_v30, %v324_v27 }
 0x112   :  { %v386_v38 = vmax.f32 %v325_v32, 0.0 }
 0x117   :  { %v326_v34 = vpop.f32.mrf.mxu0 }
 0x118   :  { %v327_v35 = vadd.f32 %v1508_v30, %v326_v34 }
 0x11a   :  { %v387_v39 = vmax.f32 %v327_v35, 0.0 }
 0x11c   :  { %v412_v42 = vpack.c.bf16 %v387_v39, %v386_v38 }
 0x11e   :  { %528 = vmatmul.bf16.gmra.mxu1 %v412_v42 }
 0x11f   :  { %v329_v46 = vpop.f32.mrf.mxu0 }
 0x120   :  { %v330_v50 = vadd.f32 %v1508_v30, %v329_v46 }
 0x122   :  { %v388_v55 = vmax.f32 %v330_v50, 0.0 }
 0x127   :  { %v331_v52 = vpop.f32.mrf.mxu0 }
 0x128   :  { %v332_v53 = vadd.f32 %v1508_v30, %v331_v52 }
 0x12a   :  { %v389_v56 = vmax.f32 %v332_v53, 0.0 }
 0x12c   :  { %v413_v59 = vpack.c.bf16 %v389_v56, %v388_v55 }
 0x12e   :  { %533 = vmatmul.bf16.gmra.mxu1 %v413_v59 }
 0x12f   :  { %v334_v62 = vpop.f32.mrf.mxu0 }
 0x130   :  { %v335_v63 = vadd.f32 %v1508_v30, %v334_v62 }
 0x132   :  { %v390_v2 = vmax.f32 %v335_v63, 0.0 }
 0x137   :  { %v336_v0 = vpop.f32.mrf.mxu0 }
 0x138   :  { %v337_v1 = vadd.f32 %v1508_v30, %v336_v0 }
 0x13a   :  { %v391_v3 = vmax.f32 %v337_v1, 0.0 }
 0x13b   :  { %v499_v4 = vpop.f32.mrf.mxu1 }
 0x13c   :  { %v414_v5 = vpack.c.bf16 %v391_v3, %v390_v2  ;;  %v500_v8 = vadd.f32 %v1539_v6, %v499_v4 }
 0x13e   :  { %538 = vmatmul.bf16.gmra.mxu1 %v414_v5  ;;  %v579_v11 = vmax.f32 %v500_v8, 0.0 }
 0x13f   :  { %v339_v7 = vpop.f32.mrf.mxu0 }
 0x140   :  { %v340_v12 = vadd.f32 %v1508_v30, %v339_v7 }
 0x142   :  { %v392_v17 = vmax.f32 %v340_v12, 0.0 }
 0x143   :  { %v501_v9 = vpop.f32.mrf.mxu1 }
 0x144   :  { %v502_v10 = vadd.f32 %v1539_v6, %v501_v9 }
 0x146   :  { %v580_v13 = vmax.f32 %v502_v10, 0.0 }
 0x147   :  { %v341_v14 = vpop.f32.mrf.mxu0  ;;  %v559_v58 = vpop.f32.mrf.mxu3 }
 0x148   :  { %v342_v15 = vadd.f32 %v1508_v30, %v341_v14  ;;  %v611_v16 = vpack.c.bf16 %v580_v13, %v579_v11  ;;  %v560_v63 = vadd.f32 %v1539_v6, %v559_v58 }
 0x14a   :  { %v393_v18 = vmax.f32 %v342_v15, 0.0  ;;  %703 = vmatmul.bf16.vlgmr.msra.gmra.mxu2 %v611_v16  ;;  %v603_v2 = vmax.f32 %v560_v63, 0.0 }
 0x14b   :  { %v504_v19 = vpop.f32.mrf.mxu1 }
 0x14c   :  { %v415_v20 = vpack.c.bf16 %v393_v18, %v392_v17  ;;  %v505_v22 = vadd.f32 %v1539_v6, %v504_v19 }
 0x14e   :  { %543 = vmatmul.bf16.gmra.mxu1 %v415_v20  ;;  %v581_v25 = vmax.f32 %v505_v22, 0.0 }
 0x14f   :  { %v344_v21 = vpop.f32.mrf.mxu0  ;;  %v561_v1 = vpop.f32.mrf.mxu3 }
 0x150   :  { %v345_v26 = vadd.f32 %v1508_v30, %v344_v21  ;;  %v562_v3 = vadd.f32 %v1539_v6, %v561_v1 }
 0x152   :  { %v394_v32 = vmax.f32 %v345_v26, 0.0  ;;  %v604_v4 = vmax.f32 %v562_v3, 0.0 }
 0x153   :  { %v506_v23 = vpop.f32.mrf.mxu1 }
 0x154   :  { %v507_v24 = vadd.f32 %v1539_v6, %v506_v23  ;;  %v623_v5 = vpack.c.bf16 %v604_v4, %v603_v2 }
 0x156   :  { %v582_v27 = vmax.f32 %v507_v24, 0.0  ;;  %763 = vmatmul.bf16.vlgmr.msra.gmra.mxu3 %v623_v5 }
 0x157   :  { %v346_v28 = vpop.f32.mrf.mxu0  ;;  %v564_v9 = vpop.f32.mrf.mxu3 }
 0x158   :  { %v347_v29 = vadd.f32 %v1508_v30, %v346_v28  ;;  %v612_v31 = vpack.c.bf16 %v582_v27, %v581_v25  ;;  %v565_v14 = vadd.f32 %v1539_v6, %v564_v9 }
 0x15a   :  { %v395_v33 = vmax.f32 %v347_v29, 0.0  ;;  %708 = vmatmul.bf16.gmra.mxu2 %v612_v31  ;;  %v605_v17 = vmax.f32 %v565_v14, 0.0 }
 0x15b   :  { %v509_v34 = vpop.f32.mrf.mxu1 }
 0x15c   :  { %v416_v35 = vpack.c.bf16 %v395_v33, %v394_v32  ;;  %v510_v37 = vadd.f32 %v1539_v6, %v509_v34 }
 0x15e   :  { %548 = vmatmul.bf16.gmra.mxu1 %v416_v35  ;;  %v583_v40 = vmax.f32 %v510_v37, 0.0 }
 0x15f   :  { %v349_v36 = vpop.f32.mrf.mxu0  ;;  %v566_v16 = vpop.f32.mrf.mxu3 }
 0x160   :  { %v350_v41 = vadd.f32 %v1508_v30, %v349_v36  ;;  %v567_v18 = vadd.f32 %v1539_v6, %v566_v16 }
 0x162   :  { %v396_v46 = vmax.f32 %v350_v41, 0.0  ;;  %v606_v19 = vmax.f32 %v567_v18, 0.0 }
 0x163   :  { %v511_v38 = vpop.f32.mrf.mxu1 }
 0x164   :  { %v512_v39 = vadd.f32 %v1539_v6, %v511_v38  ;;  %v624_v20 = vpack.c.bf16 %v606_v19, %v605_v17 }
 0x166   :  { %v584_v42 = vmax.f32 %v512_v39, 0.0  ;;  %768 = vmatmul.bf16.gmra.mxu3 %v624_v20 }
 0x167   :  { %v351_v43 = vpop.f32.mrf.mxu0  ;;  %v569_v23 = vpop.f32.mrf.mxu3 }
 0x168   :  { %v352_v44 = vadd.f32 %v1508_v30, %v351_v43  ;;  %v613_v45 = vpack.c.bf16 %v584_v42, %v583_v40  ;;  %v570_v28 = vadd.f32 %v1539_v6, %v569_v23 }
 0x16a   :  { %v397_v47 = vmax.f32 %v352_v44, 0.0  ;;  %713 = vmatmul.bf16.gmra.mxu2 %v613_v45  ;;  %v607_v32 = vmax.f32 %v570_v28, 0.0 }
 0x16b   :  { %v514_v48 = vpop.f32.mrf.mxu1 }
 0x16c   :  { %v417_v49 = vpack.c.bf16 %v397_v47, %v396_v46  ;;  %v515_v50 = vadd.f32 %v1539_v6, %v514_v48 }
 0x16e   :  { %553 = vmatmul.bf16.gmra.mxu1 %v417_v49  ;;  %v585_v53 = vmax.f32 %v515_v50, 0.0 }
 0x16f   :  { %v571_v31 = vpop.f32.mrf.mxu3 }
 0x170   :  { %v572_v33 = vadd.f32 %v1539_v6, %v571_v31 }
 0x172   :  { %v608_v34 = vmax.f32 %v572_v33, 0.0 }
 0x173   :  { %v516_v51 = vpop.f32.mrf.mxu1 }
 0x174   :  { %v517_v52 = vadd.f32 %v1539_v6, %v516_v51  ;;  %v625_v35 = vpack.c.bf16 %v608_v34, %v607_v32 }
 0x176   :  { %v586_v54 = vmax.f32 %v517_v52, 0.0  ;;  %773 = vmatmul.bf16.gmra.mxu3 %v625_v35 }
 0x177   :  { %v574_v38 = vpop.f32.mrf.mxu3 }
 0x178   :  { %v614_v55 = vpack.c.bf16 %v586_v54, %v585_v53  ;;  %v575_v45 = vadd.f32 %v1539_v6, %v574_v38 }
 0x17a   :  { %718 = vmatmul.bf16.gmra.mxu2 %v614_v55  ;;  %v609_v47 = vmax.f32 %v575_v45, 0.0 }
 0x17b   :  { %v519_v56 = vpop.f32.mrf.mxu1 }
 0x17c   :  { %v520_v57 = vadd.f32 %v1539_v6, %v519_v56  ;;  %v1576_v56 = vld [vmem:[%s1750_s6] ss:$0 sm:$0xff] }
 0x17e   :  { %v587_v60 = vmax.f32 %v520_v57, 0.0 }
 0x17f   :  { %v576_v44 = vpop.f32.mrf.mxu3 }
 0x180   :  { %v577_v46 = vadd.f32 %v1539_v6, %v576_v44 }
 0x182   :  { %v610_v48 = vmax.f32 %v577_v46, 0.0 }
 0x183   :  { %v521_v30 = vpop.f32.mrf.mxu1 }
 0x184   :  { %v522_v59 = vadd.f32 %v1539_v6, %v521_v30  ;;  %v626_v49 = vpack.c.bf16 %v610_v48, %v609_v47 }
 0x186   :  { %v588_v61 = vmax.f32 %v522_v59, 0.0  ;;  %778 = vmatmul.bf16.gmra.mxu3 %v626_v49 }
 0x188   :  { %v615_v62 = vpack.c.bf16 %v588_v61, %v587_v60 }
 0x18a   :  { %723 = vmatmul.bf16.gmra.mxu2 %v615_v62 }
 0x18b   :  { %v524_v0 = vpop.f32.mrf.mxu1 }
 0x18c   :  { %v525_v7 = vadd.f32 %v1539_v6, %v524_v0 }
 0x18e   :  { %v589_v11 = vmax.f32 %v525_v7, 0.0 }
 0x193   :  { %v526_v8 = vpop.f32.mrf.mxu1 }
 0x194   :  { %v527_v10 = vadd.f32 %v1539_v6, %v526_v8 }
 0x196   :  { %v590_v12 = vmax.f32 %v527_v10, 0.0 }
 0x198   :  { %v616_v13 = vpack.c.bf16 %v590_v12, %v589_v11 }
 0x19a   :  { %728 = vmatmul.bf16.gmra.mxu2 %v616_v13 }
 0x19b   :  { %v529_v15 = vpop.f32.mrf.mxu1 }
 0x19c   :  { %v530_v21 = vadd.f32 %v1539_v6, %v529_v15 }
 0x19e   :  { %v591_v25 = vmax.f32 %v530_v21, 0.0 }
 0x1a3   :  { %v531_v22 = vpop.f32.mrf.mxu1 }
 0x1a4   :  { %v532_v24 = vadd.f32 %v1539_v6, %v531_v22 }
 0x1a6   :  { %v592_v26 = vmax.f32 %v532_v24, 0.0 }
 0x1a8   :  { %v617_v27 = vpack.c.bf16 %v592_v26, %v591_v25 }
 0x1aa   :  { %733 = vmatmul.bf16.gmra.mxu2 %v617_v27 }
 0x1ab   :  { %v534_v29 = vpop.f32.mrf.mxu1 }
 0x1ac   :  { %v535_v36 = vadd.f32 %v1539_v6, %v534_v29 }
 0x1ae   :  { %v593_v40 = vmax.f32 %v535_v36, 0.0 }
 0x1b3   :  { %v536_v37 = vpop.f32.mrf.mxu1 }
 0x1b4   :  { %v537_v39 = vadd.f32 %v1539_v6, %v536_v37 }
 0x1b6   :  { %v594_v41 = vmax.f32 %v537_v39, 0.0 }
 0x1b8   :  { %v618_v42 = vpack.c.bf16 %v594_v41, %v593_v40 }
 0x1ba   :  { %738 = vmatmul.bf16.gmra.mxu2 %v618_v42 }
 0x1bb   :  { %v539_v43 = vpop.f32.mrf.mxu1 }
 0x1bc   :  { %v540_v50 = vadd.f32 %v1539_v6, %v539_v43 }
 0x1be   :  { %v595_v53 = vmax.f32 %v540_v50, 0.0 }
 0x1c3   :  { %v541_v51 = vpop.f32.mrf.mxu1 }
 0x1c4   :  { %v542_v52 = vadd.f32 %v1539_v6, %v541_v51 }
 0x1c6   :  { %v596_v54 = vmax.f32 %v542_v52, 0.0 }
 0x1c8   :  { %v619_v55 = vpack.c.bf16 %v596_v54, %v595_v53 }
 0x1ca   :  { %743 = vmatmul.bf16.gmra.mxu2 %v619_v55 }
 0x1cb   :  { %v544_v57 = vpop.f32.mrf.mxu1 }
 0x1cc   :  { %v545_v60 = vadd.f32 %v1539_v6, %v544_v57 }
 0x1cd   :  { %v704_v30 = vpop.f32.mrf.mxu2 }
 0x1ce   :  { %v705_v58 = vadd.f32 %v1576_v56, %v704_v30  ;;  %v597_v1 = vmax.f32 %v545_v60, 0.0 }
 0x1d0   :  { %v784_v59 = vsub.f32 0.0, %v705_v58 }
 0x1d2   :  { %v816_v61 = vmul.f32 1.442695, %v784_v59 }
 0x1d3   :  { %v546_v62 = vpop.f32.mrf.mxu1 }
 0x1d4   :  { %1217 = vpow2.f32 %v816_v61  ;;  %v547_v63 = vadd.f32 %v1539_v6, %v546_v62 }
 0x1d5   :  { %v706_v0 = vpop.f32.mrf.mxu2 }
 0x1d6   :  { %v598_v2 = vmax.f32 %v547_v63, 0.0  ;;  %v707_v3 = vadd.f32 %v1576_v56, %v706_v0 }
 0x1d8   :  { %v785_v4 = vsub.f32 0.0, %v707_v3  ;;  %v620_v5 = vpack.c.bf16 %v598_v2, %v597_v1 }
 0x1da   :  { %v1218_v7 = vpop.eup %1217  ;;  %v818_v8 = vmul.f32 1.442695, %v785_v4  ;;  %748 = vmatmul.bf16.gmra.mxu2 %v620_v5 }
 0x1db   :  { %v880_v9 = vadd.f32 1.0, %v1218_v7  ;;  %v549_v10 = vpop.f32.mrf.mxu1 }
 0x1dc   :  { %1219 = vpow2.f32 %v818_v8  ;;  %v550_v15 = vadd.f32 %v1539_v6, %v549_v10 }
 0x1dd   :  { %1221 = vrcp.f32 %v880_v9  ;;  %v709_v11 = vpop.f32.mrf.mxu2 }
 0x1de   :  { %v710_v12 = vadd.f32 %v1576_v56, %v709_v11  ;;  %v599_v22 = vmax.f32 %v550_v15, 0.0  ;;  %v764_v11 = vpop.f32.mrf.mxu3 }
 0x1e0   :  { %v786_v13 = vsub.f32 0.0, %v710_v12 }
 0x1e2   :  { %v1220_v14 = vpop.eup %1219  ;;  %v820_v16 = vmul.f32 1.442695, %v786_v13 }
 0x1e3   :  { %v1222_v17 = vpop.eup %1221  ;;  %v881_v18 = vadd.f32 1.0, %v1220_v14  ;;  %v551_v19 = vpop.f32.mrf.mxu1 }
 0x1e4   :  { %945 = vst.msk [vmem:[%s1751_s7] sm:$0xff] %vm944_vm0, %v1222_v17  ;;  %1223 = vpow2.f32 %v820_v16  ;;  %v552_v20 = vadd.f32 %v1539_v6, %v551_v19 }
 0x1e5   :  { %1225 = vrcp.f32 %v881_v18  ;;  %v711_v21 = vpop.f32.mrf.mxu2 }
 0x1e6   :  { %v600_v23 = vmax.f32 %v552_v20, 0.0  ;;  %v712_v24 = vadd.f32 %v1576_v56, %v711_v21  ;;  %v766_v19 = vpop.f32.mrf.mxu3  ;;  %v765_v21 = vadd.f32 %v1576_v56, %v764_v11 }
 0x1e8   :  { %v787_v25 = vsub.f32 0.0, %v712_v24  ;;  %v621_v26 = vpack.c.bf16 %v600_v23, %v599_v22  ;;  %v767_v22 = vadd.f32 %v1576_v56, %v766_v19  ;;  %v808_v24 = vsub.f32 0.0, %v765_v21 }
 0x1ea   :  { %v1224_v27 = vpop.eup %1223  ;;  %v822_v28 = vmul.f32 1.442695, %v787_v25  ;;  %753 = vmatmul.bf16.gmra.mxu2 %v621_v26  ;;  %v809_v25 = vsub.f32 0.0, %v767_v22 }
 0x1eb   :  { %v1226_v29 = vpop.eup %1225  ;;  %v882_v31 = vadd.f32 1.0, %v1224_v27  ;;  %v554_v32 = vpop.f32.mrf.mxu1 }
 0x1ec   :  { %946 = vst.msk [vmem:[%s1751_s7 + $0x8] sm:$0xff] %vm944_vm0, %v1226_v29  ;;  %1227 = vpow2.f32 %v822_v28  ;;  %v555_v37 = vadd.f32 %v1539_v6, %v554_v32  ;;  %v864_v28 = vmul.f32 1.442695, %v808_v24  ;;  %v866_v32 = vmul.f32 1.442695, %v809_v25 }
 0x1ed   :  { %1229 = vrcp.f32 %v882_v31  ;;  %v714_v33 = vpop.f32.mrf.mxu2 }
 0x1ee   :  { %v715_v34 = vadd.f32 %v1576_v56, %v714_v33  ;;  %v601_v44 = vmax.f32 %v555_v37, 0.0 }
 0x1f0   :  { %v788_v35 = vsub.f32 0.0, %v715_v34  ;;  %v769_v34 = vpop.f32.mrf.mxu3 }
 0x1f2   :  { %v1228_v36 = vpop.eup %1227  ;;  %v824_v38 = vmul.f32 1.442695, %v788_v35 }
 0x1f3   :  { %v1230_v39 = vpop.eup %1229  ;;  %v883_v40 = vadd.f32 1.0, %v1228_v36  ;;  %v556_v41 = vpop.f32.mrf.mxu1 }
 0x1f4   :  { %947 = vst.msk [vmem:[%s1751_s7 + $0x10] sm:$0xff] %vm944_vm0, %v1230_v39  ;;  %1231 = vpow2.f32 %v824_v38  ;;  %v557_v42 = vadd.f32 %v1539_v6, %v556_v41 }
 0x1f5   :  { %1233 = vrcp.f32 %v883_v40  ;;  %v716_v43 = vpop.f32.mrf.mxu2 }
 0x1f6   :  { %v602_v45 = vmax.f32 %v557_v42, 0.0  ;;  %v717_v46 = vadd.f32 %v1576_v56, %v716_v43 }
 0x1f8   :  { %v789_v47 = vsub.f32 0.0, %v717_v46  ;;  %v622_v48 = vpack.c.bf16 %v602_v45, %v601_v44  ;;  %v771_v45 = vpop.f32.mrf.mxu3 }
 0x1fa   :  { %v1232_v49 = vpop.eup %1231  ;;  %v826_v50 = vmul.f32 1.442695, %v789_v47  ;;  %758 = vmatmul.bf16.gmra.mxu2 %v622_v48  ;;  %v770_v48 = vadd.f32 %v1576_v56, %v769_v34 }
 0x1fb   :  { %v1234_v51 = vpop.eup %1233  ;;  %v884_v52 = vadd.f32 1.0, %v1232_v49  ;;  %v772_v49 = vadd.f32 %v1576_v56, %v771_v45 }
 0x1fc   :  { %948 = vst.msk [vmem:[%s1751_s7 + $0x18] sm:$0xff] %vm944_vm0, %v1234_v51  ;;  %1235 = vpow2.f32 %v826_v50  ;;  %v810_v51 = vsub.f32 0.0, %v770_v48 }
 0x1fd   :  { %1237 = vrcp.f32 %v884_v52  ;;  %v719_v6 = vpop.f32.mrf.mxu2  ;;  %v811_v52 = vsub.f32 0.0, %v772_v49 }
 0x1fe   :  { %v720_v53 = vadd.f32 %v1576_v56, %v719_v6 }
 0x200   :  { %v790_v54 = vsub.f32 0.0, %v720_v53 }
 0x202   :  { %v1236_v55 = vpop.eup %1235  ;;  %v828_v57 = vmul.f32 1.442695, %v790_v54  ;;  %v868_v54 = vmul.f32 1.442695, %v810_v51 }
 0x203   :  { %v1238_v30 = vpop.eup %1237  ;;  %v885_v58 = vadd.f32 1.0, %v1236_v55 }
 0x204   :  { %949 = vst.msk [vmem:[%s1751_s7 + $0x20] sm:$0xff] %vm944_vm0, %v1238_v30  ;;  %1239 = vpow2.f32 %v828_v57  ;;  %v870_v30 = vmul.f32 1.442695, %v811_v52 }
 0x205   :  { %1241 = vrcp.f32 %v885_v58  ;;  %v721_v59 = vpop.f32.mrf.mxu2 }
 0x206   :  { %v722_v60 = vadd.f32 %v1576_v56, %v721_v59 }
 0x208   :  { %v791_v61 = vsub.f32 0.0, %v722_v60  ;;  %v774_v60 = vpop.f32.mrf.mxu3 }
 0x20a   :  { %v1240_v62 = vpop.eup %1239  ;;  %v830_v63 = vmul.f32 1.442695, %v791_v61 }
 0x20b   :  { %v1242_v0 = vpop.eup %1241  ;;  %v886_v1 = vadd.f32 1.0, %v1240_v62 }
 0x20c   :  { %950 = vst.msk [vmem:[%s1751_s7 + $0x28] sm:$0xff] %vm944_vm0, %v1242_v0  ;;  %1243 = vpow2.f32 %v830_v63 }
 0x20d   :  { %1245 = vrcp.f32 %v886_v1  ;;  %v724_v2 = vpop.f32.mrf.mxu2 }
 0x20e   :  { %v725_v3 = vadd.f32 %v1576_v56, %v724_v2 }
 0x210   :  { %v792_v4 = vsub.f32 0.0, %v725_v3 }
 0x212   :  { %v1244_v5 = vpop.eup %1243  ;;  %v832_v7 = vmul.f32 1.442695, %v792_v4 }
 0x213   :  { %v1246_v8 = vpop.eup %1245  ;;  %v887_v9 = vadd.f32 1.0, %v1244_v5 }
 0x214   :  { %951 = vst.msk [vmem:[%s1751_s7 + $0x30] sm:$0xff] %vm944_vm0, %v1246_v8  ;;  %1247 = vpow2.f32 %v832_v7 }
 0x215   :  { %1249 = vrcp.f32 %v887_v9  ;;  %v726_v10 = vpop.f32.mrf.mxu2  ;;  %v776_v9 = vpop.f32.mrf.mxu3 }
 0x216   :  { %v727_v12 = vadd.f32 %v1576_v56, %v726_v10 }
 0x218   :  { %v793_v13 = vsub.f32 0.0, %v727_v12  ;;  %v775_v12 = vadd.f32 %v1576_v56, %v774_v60 }
 0x21a   :  { %v1248_v14 = vpop.eup %1247  ;;  %v834_v15 = vmul.f32 1.442695, %v793_v13  ;;  %v777_v13 = vadd.f32 %v1576_v56, %v776_v9 }
 0x21b   :  { %v1250_v16 = vpop.eup %1249  ;;  %v888_v17 = vadd.f32 1.0, %v1248_v14 }
 0x21c   :  { %952 = vst.msk [vmem:[%s1751_s7 + $0x38] sm:$0xff] %vm944_vm0, %v1250_v16  ;;  %1251 = vpow2.f32 %v834_v15  ;;  %v812_v15 = vsub.f32 0.0, %v775_v12  ;;  %v813_v16 = vsub.f32 0.0, %v777_v13 }
 0x21d   :  { %1253 = vrcp.f32 %v888_v17  ;;  %v729_v18 = vpop.f32.mrf.mxu2  ;;  %v779_v25 = vpop.f32.mrf.mxu3 }
 0x21e   :  { %v730_v20 = vadd.f32 %v1576_v56, %v729_v18  ;;  %v872_v19 = vmul.f32 1.442695, %v812_v15  ;;  %v874_v22 = vmul.f32 1.442695, %v813_v16 }
 0x220   :  { %v794_v23 = vsub.f32 0.0, %v730_v20 }
 0x222   :  { %v1252_v26 = vpop.eup %1251  ;;  %v836_v27 = vmul.f32 1.442695, %v794_v23 }
 0x223   :  { %v1254_v29 = vpop.eup %1253  ;;  %v889_v31 = vadd.f32 1.0, %v1252_v26 }
 0x224   :  { %953 = vst.msk [vmem:[%s1751_s7 + $0x40] sm:$0xff] %vm944_vm0, %v1254_v29  ;;  %1255 = vpow2.f32 %v836_v27 }
 0x225   :  { %1257 = vrcp.f32 %v889_v31  ;;  %v731_v33 = vpop.f32.mrf.mxu2 }
 0x226   :  { %v732_v35 = vadd.f32 %v1576_v56, %v731_v33  ;;  %1259 = vpow2.f32 %v864_v28 }
 0x227   :  { %1261 = vpow2.f32 %v866_v32 }
 0x228   :  { %v795_v36 = vsub.f32 0.0, %v732_v35 }
 0x22a   :  { %v1256_v37 = vpop.eup %1255  ;;  %v838_v38 = vmul.f32 1.442695, %v795_v36 }
 0x22b   :  { %v1258_v39 = vpop.eup %1257  ;;  %v890_v40 = vadd.f32 1.0, %v1256_v37 }
 0x22c   :  { %v1260_v41 = vpop.eup %1259  ;;  %954 = vst.msk [vmem:[%s1751_s7 + $0x48] sm:$0xff] %vm944_vm0, %v1258_v39  ;;  %1263 = vpow2.f32 %v838_v38  ;;  %v781_v38 = vpop.f32.mrf.mxu3 }
 0x22d   :  { %v1262_v42 = vpop.eup %1261  ;;  %1265 = vrcp.f32 %v890_v40  ;;  %v734_v43 = vpop.f32.mrf.mxu2  ;;  %v904_v44 = vadd.f32 1.0, %v1260_v41  ;;  %v780_v41 = vadd.f32 %v1576_v56, %v779_v25 }
 0x22e   :  { %v735_v46 = vadd.f32 %v1576_v56, %v734_v43  ;;  %v905_v47 = vadd.f32 1.0, %v1262_v42  ;;  %v782_v42 = vadd.f32 %v1576_v56, %v781_v38 }
 0x22f   :  { %1267 = vrcp.f32 %v904_v44  ;;  %v814_v44 = vsub.f32 0.0, %v780_v41 }
 0x230   :  { %v796_v50 = vsub.f32 0.0, %v735_v46  ;;  %1269 = vrcp.f32 %v905_v47  ;;  %v815_v45 = vsub.f32 0.0, %v782_v42 }
 0x231   :  { %v876_v48 = vmul.f32 1.442695, %v814_v44 }
 0x232   :  { %v1264_v6 = vpop.eup %1263  ;;  %v840_v53 = vmul.f32 1.442695, %v796_v50  ;;  %v878_v51 = vmul.f32 1.442695, %v815_v45 }
 0x233   :  { %v1266_v55 = vpop.eup %1265  ;;  %v891_v57 = vadd.f32 1.0, %v1264_v6 }
 0x234   :  { %955 = vst.msk [vmem:[%s1751_s7 + $0x50] sm:$0xff] %vm944_vm0, %v1266_v55  ;;  %1271 = vpow2.f32 %v840_v53 }
 0x235   :  { %v1268_v58 = vpop.eup %1267  ;;  %1273 = vrcp.f32 %v891_v57  ;;  %v736_v59 = vpop.f32.mrf.mxu2 }
 0x236   :  { %v1270_v61 = vpop.eup %1269  ;;  %v737_v62 = vadd.f32 %v1576_v56, %v736_v59  ;;  %969 = vst.msk [vmem:[%s1751_s7 + $0xc0] sm:$0xff] %vm944_vm0, %v1268_v58  ;;  %1275 = vpow2.f32 %v868_v54 }
 0x237   :  { %970 = vst.msk [vmem:[%s1751_s7 + $0xc8] sm:$0xff] %vm944_vm0, %v1270_v61  ;;  %1277 = vpow2.f32 %v870_v30 }
 0x238   :  { %v797_v63 = vsub.f32 0.0, %v737_v62 }
 0x23a   :  { %v1272_v0 = vpop.eup %1271  ;;  %v842_v1 = vmul.f32 1.442695, %v797_v63 }
 0x23b   :  { %v1274_v2 = vpop.eup %1273  ;;  %v892_v3 = vadd.f32 1.0, %v1272_v0 }
 0x23c   :  { %v1276_v4 = vpop.eup %1275  ;;  %956 = vst.msk [vmem:[%s1751_s7 + $0x58] sm:$0xff] %vm944_vm0, %v1274_v2  ;;  %1279 = vpow2.f32 %v842_v1 }
 0x23d   :  { %v1278_v5 = vpop.eup %1277  ;;  %1281 = vrcp.f32 %v892_v3  ;;  %v739_v7 = vpop.f32.mrf.mxu2  ;;  %v906_v8 = vadd.f32 1.0, %v1276_v4 }
 0x23e   :  { %v740_v10 = vadd.f32 %v1576_v56, %v739_v7  ;;  %v907_v11 = vadd.f32 1.0, %v1278_v5 }
 0x23f   :  { %1283 = vrcp.f32 %v906_v8 }
 0x240   :  { %v798_v14 = vsub.f32 0.0, %v740_v10  ;;  %1285 = vrcp.f32 %v907_v11 }
 0x242   :  { %v1280_v17 = vpop.eup %1279  ;;  %v844_v18 = vmul.f32 1.442695, %v798_v14 }
 0x243   :  { %v1282_v20 = vpop.eup %1281  ;;  %v893_v21 = vadd.f32 1.0, %v1280_v17 }
 0x244   :  { %957 = vst.msk [vmem:[%s1751_s7 + $0x60] sm:$0xff] %vm944_vm0, %v1282_v20  ;;  %1287 = vpow2.f32 %v844_v18 }
 0x245   :  { %v1284_v23 = vpop.eup %1283  ;;  %1289 = vrcp.f32 %v893_v21  ;;  %v741_v24 = vpop.f32.mrf.mxu2 }
 0x246   :  { %v1286_v26 = vpop.eup %1285  ;;  %v742_v27 = vadd.f32 %v1576_v56, %v741_v24  ;;  %971 = vst.msk [vmem:[%s1751_s7 + $0xd0] sm:$0xff] %vm944_vm0, %v1284_v23  ;;  %1291 = vpow2.f32 %v872_v19 }
 0x247   :  { %972 = vst.msk [vmem:[%s1751_s7 + $0xd8] sm:$0xff] %vm944_vm0, %v1286_v26  ;;  %1293 = vpow2.f32 %v874_v22 }
 0x248   :  { %v799_v28 = vsub.f32 0.0, %v742_v27 }
 0x24a   :  { %v1288_v29 = vpop.eup %1287  ;;  %v846_v31 = vmul.f32 1.442695, %v799_v28 }
 0x24b   :  { %v1290_v32 = vpop.eup %1289  ;;  %v894_v33 = vadd.f32 1.0, %v1288_v29 }
 0x24c   :  { %v1292_v34 = vpop.eup %1291  ;;  %958 = vst.msk [vmem:[%s1751_s7 + $0x68] sm:$0xff] %vm944_vm0, %v1290_v32  ;;  %1295 = vpow2.f32 %v846_v31 }
 0x24d   :  { %v1294_v35 = vpop.eup %1293  ;;  %1297 = vrcp.f32 %v894_v33  ;;  %v744_v36 = vpop.f32.mrf.mxu2  ;;  %v908_v37 = vadd.f32 1.0, %v1292_v34 }
 0x24e   :  { %v745_v39 = vadd.f32 %v1576_v56, %v744_v36  ;;  %v909_v40 = vadd.f32 1.0, %v1294_v35 }
 0x24f   :  { %1299 = vrcp.f32 %v908_v37 }
 0x250   :  { %v800_v43 = vsub.f32 0.0, %v745_v39  ;;  %1301 = vrcp.f32 %v909_v40 }
 0x252   :  { %v1296_v46 = vpop.eup %1295  ;;  %v848_v47 = vmul.f32 1.442695, %v800_v43 }
 0x253   :  { %v1298_v49 = vpop.eup %1297  ;;  %v895_v50 = vadd.f32 1.0, %v1296_v46 }
 0x254   :  { %959 = vst.msk [vmem:[%s1751_s7 + $0x70] sm:$0xff] %vm944_vm0, %v1298_v49  ;;  %1303 = vpow2.f32 %v848_v47 }
 0x255   :  { %v1300_v52 = vpop.eup %1299  ;;  %1305 = vrcp.f32 %v895_v50  ;;  %v746_v6 = vpop.f32.mrf.mxu2 }
 0x256   :  { %v1302_v53 = vpop.eup %1301  ;;  %v747_v54 = vadd.f32 %v1576_v56, %v746_v6  ;;  %973 = vst.msk [vmem:[%s1751_s7 + $0xe0] sm:$0xff] %vm944_vm0, %v1300_v52  ;;  %1307 = vpow2.f32 %v876_v48 }
 0x257   :  { %974 = vst.msk [vmem:[%s1751_s7 + $0xe8] sm:$0xff] %vm944_vm0, %v1302_v53  ;;  %1309 = vpow2.f32 %v878_v51 }
 0x258   :  { %v801_v55 = vsub.f32 0.0, %v747_v54 }
 0x25a   :  { %v1304_v57 = vpop.eup %1303  ;;  %v850_v30 = vmul.f32 1.442695, %v801_v55 }
 0x25b   :  { %v1306_v58 = vpop.eup %1305  ;;  %v896_v59 = vadd.f32 1.0, %v1304_v57 }
 0x25c   :  { %v1308_v60 = vpop.eup %1307  ;;  %960 = vst.msk [vmem:[%s1751_s7 + $0x78] sm:$0xff] %vm944_vm0, %v1306_v58  ;;  %1311 = vpow2.f32 %v850_v30 }
 0x25d   :  { %v1310_v61 = vpop.eup %1309  ;;  %1313 = vrcp.f32 %v896_v59  ;;  %v749_v62 = vpop.f32.mrf.mxu2  ;;  %v910_v63 = vadd.f32 1.0, %v1308_v60 }
 0x25e   :  { %v750_v0 = vadd.f32 %v1576_v56, %v749_v62  ;;  %v911_v1 = vadd.f32 1.0, %v1310_v61 }
 0x25f   :  { %1315 = vrcp.f32 %v910_v63 }
 0x260   :  { %v802_v2 = vsub.f32 0.0, %v750_v0  ;;  %1317 = vrcp.f32 %v911_v1 }
 0x262   :  { %v1312_v3 = vpop.eup %1311  ;;  %v852_v4 = vmul.f32 1.442695, %v802_v2 }
 0x263   :  { %v1314_v5 = vpop.eup %1313  ;;  %v897_v7 = vadd.f32 1.0, %v1312_v3 }
 0x264   :  { %961 = vst.msk [vmem:[%s1751_s7 + $0x80] sm:$0xff] %vm944_vm0, %v1314_v5  ;;  %1319 = vpow2.f32 %v852_v4 }
 0x265   :  { %v1316_v8 = vpop.eup %1315  ;;  %1321 = vrcp.f32 %v897_v7  ;;  %v751_v9 = vpop.f32.mrf.mxu2 }
 0x266   :  { %v1318_v10 = vpop.eup %1317  ;;  %v752_v11 = vadd.f32 %v1576_v56, %v751_v9  ;;  %975 = vst.msk [vmem:[%s1751_s7 + $0xf0] sm:$0xff] %vm944_vm0, %v1316_v8 }
 0x267   :  { %976 = vst.msk [vmem:[%s1751_s7 + $0xf8] sm:$0xff] %vm944_vm0, %v1318_v10 }
 0x268   :  { %v803_v12 = vsub.f32 0.0, %v752_v11 }
 0x26a   :  { %v1320_v13 = vpop.eup %1319  ;;  %v854_v14 = vmul.f32 1.442695, %v803_v12 }
 0x26b   :  { %v1322_v15 = vpop.eup %1321  ;;  %v898_v16 = vadd.f32 1.0, %v1320_v13 }
 0x26c   :  { %962 = vst.msk [vmem:[%s1751_s7 + $0x88] sm:$0xff] %vm944_vm0, %v1322_v15  ;;  %1323 = vpow2.f32 %v854_v14 }
 0x26d   :  { %1325 = vrcp.f32 %v898_v16  ;;  %v754_v17 = vpop.f32.mrf.mxu2 }
 0x26e   :  { %v755_v18 = vadd.f32 %v1576_v56, %v754_v17 }
 0x270   :  { %v804_v19 = vsub.f32 0.0, %v755_v18 }
 0x272   :  { %v1324_v20 = vpop.eup %1323  ;;  %v856_v21 = vmul.f32 1.442695, %v804_v19 }
 0x273   :  { %v1326_v22 = vpop.eup %1325  ;;  %v899_v23 = vadd.f32 1.0, %v1324_v20 }
 0x274   :  { %963 = vst.msk [vmem:[%s1751_s7 + $0x90] sm:$0xff] %vm944_vm0, %v1326_v22  ;;  %1327 = vpow2.f32 %v856_v21 }
 0x275   :  { %1329 = vrcp.f32 %v899_v23  ;;  %v756_v24 = vpop.f32.mrf.mxu2 }
 0x276   :  { %v757_v25 = vadd.f32 %v1576_v56, %v756_v24 }
 0x278   :  { %v805_v26 = vsub.f32 0.0, %v757_v25 }
 0x27a   :  { %v1328_v27 = vpop.eup %1327  ;;  %v858_v28 = vmul.f32 1.442695, %v805_v26 }
 0x27b   :  { %v1330_v29 = vpop.eup %1329  ;;  %v900_v31 = vadd.f32 1.0, %v1328_v27 }
 0x27c   :  { %964 = vst.msk [vmem:[%s1751_s7 + $0x98] sm:$0xff] %vm944_vm0, %v1330_v29  ;;  %1331 = vpow2.f32 %v858_v28 }
 0x27d   :  { %1333 = vrcp.f32 %v900_v31  ;;  %v759_v32 = vpop.f32.mrf.mxu2 }
 0x27e   :  { %v760_v33 = vadd.f32 %v1576_v56, %v759_v32 }
 0x280   :  { %v806_v34 = vsub.f32 0.0, %v760_v33 }
 0x282   :  { %v1332_v35 = vpop.eup %1331  ;;  %v860_v36 = vmul.f32 1.442695, %v806_v34 }
 0x283   :  { %v1334_v37 = vpop.eup %1333  ;;  %v901_v38 = vadd.f32 1.0, %v1332_v35 }
 0x284   :  { %965 = vst.msk [vmem:[%s1751_s7 + $0xa0] sm:$0xff] %vm944_vm0, %v1334_v37  ;;  %1335 = vpow2.f32 %v860_v36 }
 0x285   :  { %1337 = vrcp.f32 %v901_v38  ;;  %v761_v39 = vpop.f32.mrf.mxu2 }
 0x286   :  { %v762_v40 = vadd.f32 %v1576_v56, %v761_v39 }
 0x288   :  { %v807_v41 = vsub.f32 0.0, %v762_v40 }
 0x28a   :  { %v1336_v42 = vpop.eup %1335  ;;  %v862_v43 = vmul.f32 1.442695, %v807_v41 }
 0x28b   :  { %v1338_v44 = vpop.eup %1337  ;;  %v902_v45 = vadd.f32 1.0, %v1336_v42 }
 0x28c   :  { %966 = vst.msk [vmem:[%s1751_s7 + $0xa8] sm:$0xff] %vm944_vm0, %v1338_v44  ;;  %1339 = vpow2.f32 %v862_v43 }
 0x28d   :  { %1341 = vrcp.f32 %v902_v45 }
 0x292   :  { %v1340_v46 = vpop.eup %1339 }
 0x293   :  { %v1342_v47 = vpop.eup %1341  ;;  %v903_v48 = vadd.f32 1.0, %v1340_v46 }
 0x294   :  { %967 = vst.msk [vmem:[%s1751_s7 + $0xb0] sm:$0xff] %vm944_vm0, %v1342_v47 }
 0x295   :  { %1343 = vrcp.f32 %v903_v48 }
 0x29b   :  { %v1344_v56 = vpop.eup %1343 }
 0x29c   :  { %968 = vst.msk [vmem:[%s1751_s7 + $0xb8] sm:$0xff] %vm944_vm0, %v1344_v56 }
 0x29d   :  { %981 = vsyncpa [#allocation3], 1 }
 0x29e   :  { %982 = vsyncpa [#allocation5], 1 }
 0x29f   :  { %983 = vsyncpa [#allocation8], 1 }

</bundles_post_ra>
